<compile_context>
chip_gen: v5e
topology: v5e:2x2
jax: 0.10.0
libtpu: 0.0.40
codegen_flags: <defaults>
</compile_context>

<pallas_src>
import functools

import jax
import jax.numpy as jnp
from jax.experimental import pallas as pl
from jax.experimental.pallas import tpu as pltpu


def _label_smoothing_tile_kernel(pred_ref, tgt_ref, out_ref, *,
                                 smooth_val, coef, dist_sum, padding_idx):
    """One (tile_n, C) row tile -> one per-tile partial sum (written as a full vreg block)."""
    p_nat = pred_ref[...]                                         # (TN, C) native dtype
    p = p_nat.astype(jnp.float32)                                 # (TN, C) f32 (only f32 tile kept)
    tgt = tgt_ref[...]                                            # (TN, 1) int32

    # log-softmax pieces along the class (lane) axis — per-row scalars only.
    m = jnp.max(p, axis=-1, keepdims=True)                        # (TN, 1)
    sum_p = jnp.sum(p, axis=-1, keepdims=True)                    # (TN, 1)
    sumexp = jnp.sum(jnp.exp(p - m), axis=-1, keepdims=True)      # (TN, 1)  (p - m fused into exp)
    lse = jnp.log(sumexp)                                         # (TN, 1)

    # one-hot gather of p[row, target[row]]: hoisted (1, C) iota, select against native dtype
    # (single nonzero per row -> the reduce is exact; upcast afterwards is lossless).
    cols = jax.lax.broadcasted_iota(jnp.int32, (1, p.shape[-1]), 1)
    onehot = cols == tgt                                          # (TN, C) bool
    p_tgt = jnp.sum(jnp.where(onehot, p_nat, 0),
                    axis=-1, keepdims=True).astype(jnp.float32)   # (TN, 1)

    # sum_c(true_dist * logp) = s*sum_c(p) + (conf - s)*p_tgt - dist_sum*(m + lse)
    row_loss = -(jnp.float32(smooth_val) * sum_p
                 + jnp.float32(coef) * p_tgt
                 - jnp.float32(dist_sum) * (m + lse))             # (TN, 1)
    keep = (tgt != padding_idx).astype(jnp.float32)               # (TN, 1)

    tile_sum = jnp.sum(row_loss * keep)                           # scalar partial sum
    # Full (8, 128) vreg store: unmasked, lane-dense, trivially small.
    out_ref[...] = jnp.broadcast_to(tile_sum, out_ref.shape).astype(jnp.float32)


def label_smoothing_loss(pred, target, *, num_classes, padding_idx,
                         smoothing=0.1, tile_n=None):
    N, C = pred.shape
    assert C == num_classes
    confidence = 1.0 - smoothing
    smooth_val = smoothing / (num_classes - 2)
    coef = confidence - smooth_val
    dist_sum = confidence + (num_classes - 1) * smooth_val

    itemsize = int(jnp.dtype(pred.dtype).itemsize)

    # --- VMEM budget (per TensorCore). v7x: 64 MiB -> ~48 usable; v5e/v6e: 128 -> ~96. ---
    try:
        vmem_cap = int(pltpu.get_tpu_info().vmem_capacity_bytes)
    except Exception:
        vmem_cap = 64 * 1024 * 1024   # conservative default (v7x per-TC size)
    usable = min((vmem_cap * 3) // 4, 96 * 1024 * 1024)

    # Working-set model per tile row:
    #   2 * C * itemsize   double-buffered native-dtype pred block
    # + 3 * C * 4          f32 intermediates (cast + exp / select passes, conservative)
    # + 2 * 512            (tile_n, 1) int32 target buffers (lane-padded to 128, double-buffered)
    per_row_bytes = 2 * C * itemsize + 3 * C * 4 + 2 * 512
    slack = 2 * 1024 * 1024

    if tile_n is None:
        tile_n = max(8, (usable - slack) // per_row_bytes)   # no artificial row cap
    tile_n = max(8, (int(tile_n) // 8) * 8)
    tile_n = min(tile_n, max(8, -(-N // 8) * 8))

    n_tiles = -(-N // tile_n)
    N_pad = n_tiles * tile_n

    tgt2d = target.astype(jnp.int32).reshape(N, 1)
    if N_pad != N:
        # padded rows get target == padding_idx, so their per-row loss is exactly 0
        pred_in = jnp.pad(pred, ((0, N_pad - N), (0, 0)))
        tgt_in = jnp.pad(tgt2d, ((0, N_pad - N), (0, 0)), constant_values=padding_idx)
    else:
        pred_in, tgt_in = pred, tgt2d

    est_bytes = tile_n * per_row_bytes + slack
    vmem_limit = int(min(max(32 * 1024 * 1024, est_bytes + 8 * 1024 * 1024),
                         vmem_cap - 4 * 1024 * 1024))

    kernel = functools.partial(
        _label_smoothing_tile_kernel,
        smooth_val=float(smooth_val),
        coef=float(coef),
        dist_sum=float(dist_sum),
        padding_idx=int(padding_idx),
    )

    partial_sums = pl.pallas_call(
        kernel,
        out_shape=jax.ShapeDtypeStruct((n_tiles * 8, 128), jnp.float32),
        grid=(n_tiles,),
        in_specs=[
            pl.BlockSpec((tile_n, C), lambda i: (i, 0)),   # pred row tile (native dtype on the wire)
            pl.BlockSpec((tile_n, 1), lambda i: (i, 0)),   # target row tile (int32 column)
        ],
        out_specs=pl.BlockSpec((8, 128), lambda i: (i, 0)),
        compiler_params=pltpu.CompilerParams(
            dimension_semantics=("parallel",),
            vmem_limit_bytes=vmem_limit,
        ),
        cost_estimate=pl.CostEstimate(
            flops=int(7 * N_pad * C),
            transcendentals=int(N_pad * C + N_pad),
            bytes_accessed=int(N_pad * C * itemsize + 4 * N_pad + n_tiles * 8 * 128 * 4),
        ),
    )(pred_in, tgt_in)

    # one value per tile (every element of a tile's (8,128) block equals its partial sum)
    tile_sums = partial_sums[0::8, 0]
    # mean divides by the original N, matching torch.mean (pad-target rows contribute 0
    # but remain in the denominator).
    return jnp.sum(tile_sums) / jnp.float32(N)


def _reference_loss(pred, target, *, num_classes, padding_idx, smoothing=0.1):
    # pure-JAX mirror of the PyTorch forward
    confidence = 1.0 - smoothing
    logp = jax.nn.log_softmax(pred.astype(jnp.float32), axis=-1)
    true_dist = jnp.full_like(logp, smoothing / (num_classes - 2))
    true_dist = true_dist.at[jnp.arange(pred.shape[0]), target].set(confidence)
    true_dist = jnp.where((target == padding_idx)[:, None], 0.0, true_dist)
    return jnp.mean(jnp.sum(-true_dist * logp, axis=-1))


if __name__ == "__main__":
    key = jax.random.PRNGKey(0)
    k1, k2, k3, k4, k5, k6 = jax.random.split(key, 6)
    pad_idx = 0

    # --- check 1: bf16 activations, lane-dense C (multiple of 128), multi-step grid ---
    N1, C1 = 512, 512
    pred1 = jax.random.normal(k1, (N1, C1), dtype=jnp.float32).astype(jnp.bfloat16)
    tgt1 = jax.random.randint(k2, (N1,), 0, C1, dtype=jnp.int32)
    tgt1 = tgt1.at[jnp.array([3, 17, 100])].set(pad_idx)
    loss1 = jax.block_until_ready(
        label_smoothing_loss(pred1, tgt1, num_classes=C1, padding_idx=pad_idx,
                             smoothing=0.1, tile_n=128))
    ref1 = _reference_loss(pred1, tgt1, num_classes=C1, padding_idx=pad_idx, smoothing=0.1)
    assert jnp.allclose(loss1, ref1, rtol=1e-4, atol=1e-4), (loss1, ref1)

    # --- check 2: small/odd shapes (C=32, N not a multiple of tile_n), f32 inputs ---
    N2, C2 = 40, 32
    pred2 = jax.random.normal(k3, (N2, C2), dtype=jnp.float32)
    tgt2 = jax.random.randint(k4, (N2,), 0, C2, dtype=jnp.int32)
    tgt2 = tgt2.at[5].set(pad_idx)
    loss2 = jax.block_until_ready(
        label_smoothing_loss(pred2, tgt2, num_classes=C2, padding_idx=pad_idx,
                             smoothing=0.1, tile_n=16))
    ref2 = _reference_loss(pred2, tgt2, num_classes=C2, padding_idx=pad_idx, smoothing=0.1)
    assert jnp.allclose(loss2, ref2, rtol=1e-4, atol=1e-4), (loss2, ref2)

    # --- check 3: automatic tile sizing (VMEM-budget driven), N needs row padding ---
    N3, C3 = 260, 384
    pred3 = jax.random.normal(k5, (N3, C3), dtype=jnp.bfloat16)
    tgt3 = jax.random.randint(k6, (N3,), 0, C3, dtype=jnp.int32)
    tgt3 = tgt3.at[jnp.array([0, 7, 200])].set(pad_idx)
    loss3 = jax.block_until_ready(
        label_smoothing_loss(pred3, tgt3, num_classes=C3, padding_idx=pad_idx,
                             smoothing=0.1, tile_n=None))
    ref3 = _reference_loss(pred3, tgt3, num_classes=C3, padding_idx=pad_idx, smoothing=0.1)
    assert jnp.allclose(loss3, ref3, rtol=1e-4, atol=1e-4), (loss3, ref3)

    print("KERNEL_OK")
</pallas_src>

<mosaic_0001>
module attributes {stable_mosaic.version = 11 : i64} {
  func.func @_label_smoothing_tile_kernel(%arg0: i32, %arg1: memref<128x512xbf16, #tpu.memory_space<vmem>>, %arg2: memref<128x1xi32, #tpu.memory_space<vmem>>, %arg3: memref<8x128xf32, #tpu.memory_space<vmem>>) attributes {dimension_semantics = [#tpu.dimension_semantics<parallel>], iteration_bounds = array<i64: 4>, scalar_prefetch = 0 : i64, scratch_operands = 0 : i64, tpu.core_type = #tpu.core_type<tc>, window_params = [{transform_indices = @transform_0, window_bounds = array<i64: 128, 512>}, {transform_indices = @transform_1, window_bounds = array<i64: 128, 1>}, {transform_indices = @transform_2, window_bounds = array<i64: 8, 128>}]} {
    %c0 = arith.constant 0 : index
    %c0_0 = arith.constant 0 : index
    %0 = vector.load %arg1[%c0, %c0_0] : memref<128x512xbf16, #tpu.memory_space<vmem>>, vector<128x512xbf16>
    %1 = arith.extf %0 : vector<128x512xbf16> to vector<128x512xf32>
    %c0_1 = arith.constant 0 : index
    %c0_2 = arith.constant 0 : index
    %2 = vector.load %arg2[%c0_1, %c0_2] : memref<128x1xi32, #tpu.memory_space<vmem>>, vector<128x1xi32>
    %cst = arith.constant dense<0xFF800000> : vector<128xf32>
    %3 = vector.multi_reduction <maximumf>, %1, %cst [1] : vector<128x512xf32> to vector<128xf32>
    %4 = vector.shape_cast %3 : vector<128xf32> to vector<128x1xf32>
    %cst_3 = arith.constant dense<0.000000e+00> : vector<128xf32>
    %5 = vector.multi_reduction <add>, %1, %cst_3 [1] : vector<128x512xf32> to vector<128xf32>
    %6 = vector.shape_cast %5 : vector<128xf32> to vector<128x1xf32>
    %7 = vector.broadcast %4 : vector<128x1xf32> to vector<128x512xf32>
    %8 = arith.subf %1, %7 : vector<128x512xf32>
    %9 = math.exp %8 : vector<128x512xf32>
    %cst_4 = arith.constant dense<0.000000e+00> : vector<128xf32>
    %10 = vector.multi_reduction <add>, %9, %cst_4 [1] : vector<128x512xf32> to vector<128xf32>
    %11 = vector.shape_cast %10 : vector<128xf32> to vector<128x1xf32>
    %12 = math.log %11 : vector<128x1xf32>
    %13 = tpu.iota {dimensions = array<i32: 1>} : vector<1x512xi32>
    %14 = vector.broadcast %13 : vector<1x512xi32> to vector<128x512xi32>
    %15 = vector.broadcast %2 : vector<128x1xi32> to vector<128x512xi32>
    %16 = arith.cmpi eq, %14, %15 : vector<128x512xi32>
    %c0_i32 = arith.constant 0 : i32
    %17 = arith.sitofp %c0_i32 : i32 to bf16
    %18 = vector.broadcast %17 : bf16 to vector<128x512xbf16>
    %19 = arith.select %16, %0, %18 : vector<128x512xi1>, vector<128x512xbf16>
    %20 = arith.extf %19 : vector<128x512xbf16> to vector<128x512xf32>
    %cst_5 = arith.constant dense<0.000000e+00> : vector<128xf32>
    %21 = vector.multi_reduction <add>, %20, %cst_5 [1] : vector<128x512xf32> to vector<128xf32>
    %22 = vector.shape_cast %21 : vector<128xf32> to vector<128x1xf32>
    %23 = arith.truncf %22 : vector<128x1xf32> to vector<128x1xbf16>
    %24 = arith.extf %23 : vector<128x1xbf16> to vector<128x1xf32>
    %cst_6 = arith.constant 1.96078428E-4 : f32
    %25 = vector.broadcast %cst_6 : f32 to vector<128x1xf32>
    %26 = arith.mulf %25, %6 : vector<128x1xf32>
    %cst_7 = arith.constant 0.899803936 : f32
    %27 = vector.broadcast %cst_7 : f32 to vector<128x1xf32>
    %28 = arith.mulf %27, %24 : vector<128x1xf32>
    %29 = arith.addf %26, %28 : vector<128x1xf32>
    %30 = arith.addf %4, %12 : vector<128x1xf32>
    %cst_8 = arith.constant 1.0001961 : f32
    %31 = vector.broadcast %cst_8 : f32 to vector<128x1xf32>
    %32 = arith.mulf %31, %30 : vector<128x1xf32>
    %33 = arith.subf %29, %32 : vector<128x1xf32>
    %cst_9 = arith.constant 0.000000e+00 : f32
    %34 = vector.broadcast %cst_9 : f32 to vector<128x1xf32>
    %35 = arith.subf %34, %33 : vector<128x1xf32>
    %c0_i32_10 = arith.constant 0 : i32
    %36 = vector.broadcast %c0_i32_10 : i32 to vector<128x1xi32>
    %37 = arith.cmpi ne, %2, %36 : vector<128x1xi32>
    %38 = arith.extui %37 : vector<128x1xi1> to vector<128x1xi32>
    %39 = arith.sitofp %38 : vector<128x1xi32> to vector<128x1xf32>
    %40 = arith.mulf %35, %39 : vector<128x1xf32>
    %41 = vector.shape_cast %40 : vector<128x1xf32> to vector<1x128x1xf32>
    %cst_11 = arith.constant dense<0.000000e+00> : vector<1xf32>
    %42 = vector.multi_reduction <add>, %41, %cst_11 [1, 2] : vector<1x128x1xf32> to vector<1xf32>
    %43 = vector.shape_cast %42 : vector<1xf32> to vector<1x1x1xf32>
    %44 = vector.extract %43[0, 0, 0] : f32 from vector<1x1x1xf32>
    %45 = vector.broadcast %44 : f32 to vector<8x128xf32>
    %c0_12 = arith.constant 0 : index
    %c0_13 = arith.constant 0 : index
    %46 = vector.load %arg3[%c0_12, %c0_13] : memref<8x128xf32, #tpu.memory_space<vmem>>, vector<8x128xf32>
    tpu.vector_store %arg3[%c0_12, %c0_13], %45 {strides = array<i32>} : memref<8x128xf32, #tpu.memory_space<vmem>>, vector<8x128xf32>,
    return
  }
  func.func @transform_0(%arg0: i32) -> (i32, i32) {
    %c0_i32 = arith.constant 0 : i32
    %c0_i32_0 = arith.constant 0 : i32
    return %arg0, %c0_i32 : i32, i32
  }
  func.func @transform_1(%arg0: i32) -> (i32, i32) {
    %c0_i32 = arith.constant 0 : i32
    %c0_i32_0 = arith.constant 0 : i32
    return %arg0, %c0_i32 : i32, i32
  }
  func.func @transform_2(%arg0: i32) -> (i32, i32) {
    %c0_i32 = arith.constant 0 : i32
    %c0_i32_0 = arith.constant 0 : i32
    return %arg0, %c0_i32 : i32, i32
  }
}

</mosaic_0001>

<bundles_post_ra>
// kernel: tpu_custom_call.1
= control target key start
LH: loop header
LB: loop body
LE: loop exit
PB: predicated region body
PF: predicated region fallthrough
CT: control target
= control target key end

     0   :  { %7 = vsyncpa [#allocation3], 0  ;;  %s3142_s0 = inlined_call_operand.hbm [shape: bf16[512,512], index: 0, kind: input, shape index: {}]   ;;  %s3143_s1 = inlined_call_operand.vmem [shape: s32[512,1], index: 1, kind: input, shape index: {}]   ;;  %s3144_s2 = inlined_call_operand.hbm [shape: f32[32,128], index: 2, kind: output, shape index: {}]  }
   0x1   :  { %9 = vsyncpa [#allocation3 + $0x1], 0 }
   0x2   :  { %10 = vsyncpa [#allocation4], 0 }
   0x3   :  { %12 = vsyncpa [#allocation4 + $0x1], 0  ;;  %s1846_s9 = smov 0   ;;  %s1848_s10 = smov 0  }
   0x4   :  { %s1850_s11 = smov 0   ;;  %s1852_s12 = smov 0  }
   0x5 LB: > { %s1867_s13 = sadd.s32 4294967295, %s1825_s12   ;;  %s1439_s14 = sadd.s32 4294967294, %s1825_s12   ;;  %s1825_s12 = sphi %s1852_s12, %s3402_s12   ;;  %s1821_s11 = sphi %s1850_s11, %s3401_s11   ;;  %s1817_s10 = sphi %s1848_s10, %s3400_s10   ;;  %s1813_s9 = sphi %s1846_s9, %s3399_s9  }
   0x6   : > { %s1871_s15 = sadd.s32 1, %s1825_s12   ;;  %s25_s16 = sadd.s32 1, %s1821_s11 }
   0x7   : > { %s22_s17 = ssub.s32 %s1825_s12, %s1871_s15  ;;  %p32_p0 = scmp.ne.s32.totalorder %s1821_s11, %s1817_s10 }
   0x8   : > { %p23_p1 = scmp.eq.s32.totalorder %s22_s17, 0  ;;  %p33_p2 = scmp.eq.s32.totalorder %s1825_s12, 0 }
   0x9   : > { %p38_p3 = scmp.ne.s32.totalorder %s1817_s10, %s1813_s9  ;;  %p39_p4 = scmp.eq.s32.totalorder %s1867_s13, 0 }
   0xa   : > { %s1883_s18 = scalar_select %p23_p1, %s1821_s11, %s25_s16  }
   0xb   : > { %p1885_p5 = por %p33_p2, %p32_p0  ;;  %p1889_p6 = por %p39_p4, %p38_p3 }
   0xc   : > { %p88_p7 = scmp.eq.s32.totalorder %s1867_s13, 3  ;;  %p94_p8 = scmp.eq.s32.totalorder %s1439_s14, 3 }
   0xd   : > { %p1487_p9 = scmp.lt.s32.totalorder %s1825_s12, 4  ;;  %s114_s23 = sand.u32 1, %s1821_s11  }
   0xe   : > { %p1895_p10 = por %p88_p7, %p32_p0  ;;  %p1899_p11 = por %p94_p8, %p38_p3 }
   0xf   : > { %s1472_s24 = sshll.u32 %s1825_s12, 8  ;;  %s1442_s25 = sshll.u32 %s114_s23, 8 }
  0x10   : > { %s124_s28 = scalar_lea.hbm %s3142_s0, %s1472_s24  ;;  %s118_s30 = scalar_lea.vmem [#allocation2], %s1442_s25 }
  0x11   : > { %s125_s29 = sshll.u32 %s124_s28, 4  ;;  %s127_s3 = sshll.u32 %s118_s30, 4  ;;  %s126_s29 = int_to_ptr.hbm [resolvable:$true] %s125_s29  ;;  %s128_s3 = int_to_ptr.vmem [resolvable:$true] %s127_s3 }
  0x12   : > { %p1910_p12 = pnand %p1487_p9, %p1885_p5  ;;  %p1446_p13 = scmp.ge.s32.totalorder %s1825_s12, 1 }
  0x13   : > { %p144_p0 = scmp.lt.s32.totalorder %s1825_s12, 5  ;;  %s115_s5 = scalar_lea.sflag [#allocation3], %s114_s23 }
  0x14   : > { %s1729_s6 = sshra.s32 %s126_s29, 4  ;;  %p1733_p2 = pneg %p1910_p12  ;;  %s1730_s6 = int_to_ptr.hbm [resolvable:$true] %s1729_s6 }
  0x15   : > { %s1731_s7 = scalar_lea.hbm %s1730_s6, 256  ;;  %s1736_s16 = scalar_lea.hbm %s3142_s0, 1024 }
  0x16   : > { %p1732_p1 = scmp.ne.s32.totalorder %s1730_s6, %s1731_s7  ;;  %p1737_p5 = scmp.lt.s32.totalorder %s1730_s6, %s3142_s0 }
  0x17   : > { %p1738_p7 = scmp.lt.s32.totalorder %s1736_s16, %s1731_s7 }
  0x18   : > { %p1734_p3 = pnand %p1733_p2, %p1732_p1 }
  0x19   : > { %p1739_p8 = por %p1738_p7, %p1737_p5 }
  0x1a   : > { %p1735_p4 = pneg %p1734_p3 }
  0x1c   : > { %p1740_p9 = pnand %p1739_p8, %p1735_p4 }
  0x1e   : > { %1743 = shalt.err (!%p1740_p9)
}
  0x1f   : > { %s1827_s23 = smov 256   ;;  %s1828_s24 = smov 16  }
  0x20   : > { %1482 = dma.hbm_to_vmem [thread:$0]  (!%p1910_p12), %s126_s29, 4096, %s128_s3, %s115_s5, %s1827_s23, %s1827_s23, %s1828_s24  }
  0x21   : > { %p145_p1 = pnand %p1446_p13, %p144_p0 }
  0x23   : > { %148 = sbr.rel (%p145_p1) target bundleno = 664 (0x298), region = 28 }
  0x28   : > { %s1931_s25 = sand.u32 1, %s1817_s10  }
  0x29   : > { %s1447_s26 = sshll.u32 %s1931_s25, 8  ;;  %s151_s27 = scalar_lea.sflag [#allocation3], %s1931_s25 }
  0x2a   : > { %s1935_s28 = scalar_lea.vmem [#allocation2], %s1447_s26 }
  0x2b   : > { %1804 = dma.done.wait (%p1889_p6), %s151_s27, 4096  }
  0x2c   : > { %1806 = vsyncadd (%p1889_p6), %s151_s27, 4294963200  ;;  %v197_v0 = vld [vmem:[%s1935_s28 + $0x40] sm:$0xff]  ;;  %v198_v1 = vld [vmem:[%s1935_s28 + $0x48] sm:$0xff]  ;;  %s1449_s20 = sshll.u32 %s1867_s13, 4  ;;  %s1448_s5 = sshll.u32 %s1931_s25, 3 }
  0x2d   : > { %v1944_v2 = vld [vmem:[%s1935_s28 + $0x20] sm:$0xff]  ;;  %v1946_v3 = vunpack.c.l.bf16 %v197_v0  ;;  %v1948_v4 = vunpack.c.h.bf16 %v197_v0  ;;  %v1950_v5 = vunpack.c.l.bf16 %v198_v1  ;;  %v194_v6 = vld [vmem:[%s1935_s28 + $0x28] sm:$0xff]  ;;  %v1959_v9 = vunpack.c.h.bf16 %v198_v1  ;;  %v199_v13 = vld [vmem:[%s1935_s28 + $0x50] sm:$0xff]  ;;  %p183_p6 = scmp.lt.s32.totalorder %s1449_s20, 63  ;;  %s1468_s6 = sshll.u32 %s1867_s13, 3 }
  0x2e   : > { %3220 = vst [vmem:[#allocation8_spill] sm:$0xff] %v1944_v2  ;;  %v1954_v7 = vld [vmem:[%s1935_s28] sm:$0xff]  ;;  %v1957_v8 = vld [vmem:[%s1935_s28 + $0x8] sm:$0xff]  ;;  %v1962_v10 = vunpack.c.l.bf16 %v1944_v2  ;;  %v1965_v11 = vunpack.c.h.bf16 %v1944_v2  ;;  %v1967_v12 = vunpack.c.l.bf16 %v194_v6  ;;  %v200_v14 = vld [vmem:[%s1935_s28 + $0x58] sm:$0xff]  ;;  %v1985_v20 = vunpack.c.h.bf16 %v194_v6  ;;  %s1352_s14 = scalar_lea.hbm %s3144_s2, %s1468_s6  ;;  %s180_s16 = scalar_lea.vmem [#allocation5], %s1448_s5 }
  0x2f   : > { %3221 = vst [vmem:[#allocation9_spill] sm:$0xff] %v1954_v7  ;;  %v321_v15 = vmax.f32 %v1946_v3, %v1948_v4  ;;  %v1974_v16 = vunpack.c.l.bf16 %v1954_v7  ;;  %v1977_v17 = vunpack.c.h.bf16 %v1954_v7  ;;  %v1980_v18 = vunpack.c.l.bf16 %v1957_v8  ;;  %v1983_v19 = vld [vmem:[%s1935_s28 + $0x30] sm:$0xff]  ;;  %v1994_v24 = vld [vmem:[%s1935_s28 + $0x38] sm:$0xff]  ;;  %v205_v39 = vld [vmem:[%s1935_s28 + $0x80] sm:$0xff]  ;;  %s3404_s20 = smov (!%p183_p6, %s1449_s20), 63  ;;  %s1354_s17 = sshll.u32 %s180_s16, 4  ;;  %s1355_s17 = int_to_ptr.vmem [resolvable:$true] %s1354_s17 }
  0x30   : > { %3222 = vst [vmem:[#allocation10_spill] sm:$0xff] %v1957_v8  ;;  %v311_v21 = vmax.f32 %v1962_v10, %v1965_v11  ;;  %v1989_v22 = vunpack.c.l.bf16 %v199_v13  ;;  %v1991_v23 = vunpack.c.h.bf16 %v199_v13  ;;  %v1998_v26 = vunpack.c.h.bf16 %v1957_v8  ;;  %v2005_v29 = vld [vmem:[%s1935_s28 + $0x10] sm:$0xff]  ;;  %v2017_v34 = vld [vmem:[%s1935_s28 + $0x18] sm:$0xff]  ;;  %v206_v48 = vld [vmem:[%s1935_s28 + $0x88] sm:$0xff]  ;;  %s1450_s29 = sshll.u32 %s3404_s20, 3  ;;  %s1356_s19 = sshll.u32 %s1352_s14, 4  ;;  %s1357_s19 = int_to_ptr.hbm [resolvable:$true] %s1356_s19 }
  0x31   : > { %3223 = vst [vmem:[#allocation11_spill] sm:$0xff] %v1983_v19  ;;  %v322_v25 = vmax.f32 %v321_v15, %v1950_v5  ;;  %v301_v27 = vmax.f32 %v1974_v16, %v1977_v17  ;;  %v2002_v28 = vunpack.c.l.bf16 %v200_v14  ;;  %v2011_v32 = vunpack.c.l.bf16 %v1983_v19  ;;  %v203_v44 = vld [vmem:[%s1935_s28 + $0x70] sm:$0xff]  ;;  %v201_v53 = vld [vmem:[%s1935_s28 + $0x60] sm:$0xff]  ;;  %v204_v56 = vld [vmem:[%s1935_s28 + $0x78] sm:$0xff]  ;;  %s2229_s4 = scalar_lea.vmem %s3143_s1, %s1450_s29  ;;  %s1342_s24 = scalar_lea.sflag [#allocation4], %s1931_s25 }
  0x32   : > { %3224 = vst [vmem:[#allocation12_spill] sm:$0xff] %v1994_v24  ;;  %v312_v30 = vmax.f32 %v311_v21, %v1967_v12  ;;  %v326_v31 = vmax.f32 %v1989_v22, %v1991_v23  ;;  %v2014_v33 = vunpack.c.h.bf16 %v1983_v19  ;;  %v2021_v37 = vunpack.c.h.bf16 %v200_v14  ;;  %v202_v61 = vld [vmem:[%s1935_s28 + $0x68] sm:$0xff]  ;;  %v211_v15 = vld [vmem:[%s1935_s28 + $0xb0] sm:$0xff]  ;;  %s1773_s26 = sshra.s32 %s1357_s19, 4  ;;  %s1779_s20 = scalar_lea.hbm %s3144_s2, 32  ;;  %s1774_s26 = int_to_ptr.hbm [resolvable:$true] %s1773_s26 }
  0x33   : > { %3225 = vst [vmem:[#allocation13_spill] sm:$0xff] %v2005_v29  ;;  %v323_v35 = vmax.f32 %v322_v25, %v1959_v9  ;;  %v302_v36 = vmax.f32 %v301_v27, %v1980_v18  ;;  %v2024_v38 = vunpack.c.l.bf16 %v1994_v24  ;;  %v2032_v43 = vunpack.c.l.bf16 %v2005_v29  ;;  %v218_v19 = vld [vmem:[%s1935_s28 + $0xe8] sm:$0xff]  ;;  %s1775_s27 = scalar_lea.hbm %s1774_s26, 8  ;;  %p1780_p2 = scmp.lt.s32.totalorder %s1774_s26, %s3144_s2 }
  0x34   : > { %3226 = vst [vmem:[#allocation14_spill] sm:$0xff] %v2017_v34  ;;  %v313_v40 = vmax.f32 %v312_v30, %v1985_v20  ;;  %v327_v41 = vmax.f32 %v326_v31, %v2002_v28  ;;  %v316_v42 = vmax.f32 %v2011_v32, %v2014_v33  ;;  %v2037_v46 = vunpack.c.h.bf16 %v2005_v29  ;;  %v209_v30 = vld [vmem:[%s1935_s28 + $0xa0] sm:$0xff]  ;;  %v207_v31 = vld [vmem:[%s1935_s28 + $0x90] sm:$0xff]  ;;  %p1776_p12 = scmp.ne.s32.totalorder %s1774_s26, %s1775_s27  ;;  %p1781_p3 = scmp.lt.s32.totalorder %s1779_s20, %s1775_s27 }
  0x35   : > { %324 = vmax.xlane.f32.xlu2 %v323_v35  ;;  %v303_v45 = vmax.f32 %v302_v36, %v1998_v26  ;;  %v2040_v47 = vunpack.c.l.bf16 %v2017_v34  ;;  %v2044_v49 = vunpack.c.h.bf16 %v1994_v24  ;;  %v2047_v51 = vunpack.c.l.bf16 %v205_v39  ;;  %v213_v29 = vld [vmem:[%s1935_s28 + $0xc0] sm:$0xff] }
  0x36   : > { %314 = vmax.xlane.f32.xlu1 %v313_v40  ;;  %v317_v50 = vmax.f32 %v316_v42, %v2024_v38  ;;  %v2049_v52 = vunpack.c.h.bf16 %v205_v39  ;;  %v2053_v54 = vunpack.c.h.bf16 %v2017_v34  ;;  %v306_v55 = vmax.f32 %v2032_v43, %v2037_v46  ;;  %v215_v34 = vld [vmem:[%s1935_s28 + $0xd0] sm:$0xff]  ;;  %p1777_p13 = pnand %p1776_p12, %p1895_p10  ;;  %p1782_p4 = por %p1781_p3, %p1780_p2 }
  0x37   : > { %3227 = vst [vmem:[#allocation15_spill] sm:$0xff] %v2047_v51  ;;  %304 = vmax.xlane.f32.xlu0 %v303_v45  ;;  %v2058_v57 = vunpack.c.l.bf16 %v203_v44  ;;  %v328_v58 = vmax.f32 %v327_v41, %v2021_v37  ;;  %v2061_v59 = vunpack.c.l.bf16 %v206_v48  ;;  %v2063_v60 = vunpack.c.h.bf16 %v203_v44  ;;  %v212_v44 = vld [vmem:[%s1935_s28 + $0xb8] sm:$0xff] }
  0x38   : > { %3228 = vst [vmem:[#allocation16_spill] sm:$0xff] %v2049_v52  ;;  %v307_v62 = vmax.f32 %v306_v55, %v2040_v47  ;;  %v341_v63 = vmax.f32 %v2047_v51, %v2049_v52  ;;  %v2069_v0 = vunpack.c.l.bf16 %v201_v53  ;;  %v2071_v1 = vunpack.c.h.bf16 %v201_v53  ;;  %v210_v55 = vld [vmem:[%s1935_s28 + $0xa8] sm:$0xff]  ;;  %p1778_p0 = pneg %p1777_p13 }
  0x39   : > { %3229 = vst [vmem:[#allocation17_spill] sm:$0xff] %v2061_v59  ;;  %v318_v6 = vmax.f32 %v317_v50, %v2044_v49  ;;  %v2074_v13 = vunpack.c.l.bf16 %v204_v56  ;;  %v336_v14 = vmax.f32 %v2058_v57, %v2063_v60  ;;  %v2080_v25 = vunpack.c.l.bf16 %v202_v61 }
  0x3a   : > { %v308_v21 = vmax.f32 %v307_v62, %v2053_v54  ;;  %v331_v27 = vmax.f32 %v2069_v0, %v2071_v1  ;;  %v2086_v35 = vunpack.c.h.bf16 %v206_v48  ;;  %v342_v36 = vmax.f32 %v341_v63, %v2061_v59  ;;  %v208_v62 = vld [vmem:[%s1935_s28 + $0x98] sm:$0xff]  ;;  %p1783_p5 = pnand %p1782_p4, %p1778_p0 }
  0x3b   : > { %v2089_v39 = vunpack.c.l.bf16 %v211_v15  ;;  %v2091_v40 = vunpack.c.h.bf16 %v211_v15  ;;  %v2093_v41 = vunpack.c.h.bf16 %v204_v56  ;;  %v337_v42 = vmax.f32 %v336_v14, %v2074_v13 }
  0x3c   : > { %v2097_v45 = vunpack.c.l.bf16 %v209_v30  ;;  %v2099_v50 = vunpack.c.h.bf16 %v209_v30  ;;  %v2101_v48 = vunpack.c.h.bf16 %v202_v61  ;;  %v332_v53 = vmax.f32 %v331_v27, %v2080_v25  ;;  %v217_v27 = vld [vmem:[%s1935_s28 + $0xe0] sm:$0xff] }
  0x3d   : > { %329 = vmax.xlane.f32.xlu2 %v328_v58  ;;  %3230 = vst [vmem:[#allocation18_spill] sm:$0xff] %v2089_v39  ;;  %v2105_v58 = vunpack.c.l.bf16 %v207_v31  ;;  %v2107_v56 = vunpack.c.h.bf16 %v207_v31  ;;  %v343_v63 = vmax.f32 %v342_v36, %v2086_v35  ;;  %v356_v14 = vmax.f32 %v2089_v39, %v2091_v40 }
  0x3e   : > { %3231 = vst [vmem:[#allocation19_spill] sm:$0xff] %v2091_v40  ;;  %319 = vmax.xlane.f32.xlu1 %v318_v6  ;;  %v2111_v6 = vunpack.c.l.bf16 %v212_v44  ;;  %v338_v61 = vmax.f32 %v337_v42, %v2093_v41  ;;  %v2116_v15 = vunpack.c.l.bf16 %v210_v55  ;;  %v333_v30 = vmax.f32 %v332_v53, %v2101_v48 }
  0x3f   : > { %3232 = vst [vmem:[#allocation20_spill] sm:$0xff] %v2097_v45  ;;  %309 = vmax.xlane.f32.xlu0 %v308_v21  ;;  %v351_v21 = vmax.f32 %v2097_v45, %v2099_v50  ;;  %v2122_v31 = vunpack.c.l.bf16 %v208_v62  ;;  %v346_v36 = vmax.f32 %v2105_v58, %v2107_v56  ;;  %v2128_v8 = vunpack.c.h.bf16 %v212_v44 }
  0x40   : > { %3233 = vst [vmem:[#allocation21_spill] sm:$0xff] %v2099_v50  ;;  %v357_v42 = vmax.f32 %v356_v14, %v2111_v6  ;;  %v2131_v2 = vunpack.c.l.bf16 %v217_v27  ;;  %v2133_v7 = vunpack.c.h.bf16 %v217_v27  ;;  %v2135_v53 = vunpack.c.h.bf16 %v210_v55  ;;  %v216_v14 = vld [vmem:[%s1935_s28 + $0xd8] sm:$0xff]  ;;  %v214_v55 = vld [vmem:[%s1935_s28 + $0xc8] sm:$0xff] }
  0x41   : > { %3234 = vst [vmem:[#allocation22_spill] sm:$0xff] %v2105_v58  ;;  %v352_v24 = vmax.f32 %v351_v21, %v2116_v15  ;;  %v2141_v58 = vunpack.c.h.bf16 %v215_v34  ;;  %v2143_v44 = vunpack.c.h.bf16 %v208_v62  ;;  %v2147_v50 = vunpack.c.l.bf16 %v213_v29 }
  0x42   : > { %3235 = vst [vmem:[#allocation23_spill] sm:$0xff] %v2107_v56  ;;  %v2139_v56 = vunpack.c.l.bf16 %v215_v34  ;;  %v2149_v27 = vunpack.c.h.bf16 %v213_v29  ;;  %v2153_v21 = vunpack.c.l.bf16 %v218_v19  ;;  %v371_v34 = vmax.f32 %v2131_v2, %v2133_v7 }
  0x43   : > { %3236 = vst [vmem:[#allocation24_spill] sm:$0xff] %v2111_v6  ;;  %v2163_v29 = vunpack.c.l.bf16 %v214_v55  ;;  %v2168_v45 = vunpack.c.h.bf16 %v218_v19 }
  0x44   : > { %3237 = vst [vmem:[#allocation25_spill] sm:$0xff] %v2116_v15  ;;  %v2158_v15 = vunpack.c.l.bf16 %v216_v14  ;;  %v366_v62 = vmax.f32 %v2139_v56, %v2141_v58 }
  0x45   : > { %3238 = vst [vmem:[#allocation26_spill] sm:$0xff] %v2122_v31  ;;  %344 = vmax.xlane.f32.xlu2 %v343_v63  ;;  %v347_v63 = vmax.f32 %v346_v36, %v2122_v31  ;;  %v219_v31 = vld [vmem:[%s1935_s28 + $0xf0] sm:$0xff] }
  0x46   : > { %3239 = vst [vmem:[#allocation27_spill] sm:$0xff] %v2131_v2  ;;  %339 = vmax.xlane.f32.xlu1 %v338_v61  ;;  %v358_v61 = vmax.f32 %v357_v42, %v2128_v8  ;;  %v361_v42 = vmax.f32 %v2147_v50, %v2149_v27  ;;  %v367_v2 = vmax.f32 %v366_v62, %v2158_v15 }
  0x47   : > { %3240 = vst [vmem:[#allocation28_spill] sm:$0xff] %v2133_v7  ;;  %334 = vmax.xlane.f32.xlu0 %v333_v30  ;;  %v353_v30 = vmax.f32 %v352_v24, %v2135_v53  ;;  %v348_v36 = vmax.f32 %v347_v63, %v2143_v44  ;;  %v372_v7 = vmax.f32 %v371_v34, %v2153_v21  ;;  %v2171_v24 = vunpack.c.h.bf16 %v216_v14 }
  0x48   : > { %3241 = vst [vmem:[#allocation29_spill] sm:$0xff] %v2139_v56  ;;  %v362_v63 = vmax.f32 %v361_v42, %v2163_v29  ;;  %v2177_v56 = vunpack.c.l.bf16 %v219_v31  ;;  %v386_v14 = vadd.f32 %v2037_v46, %v2032_v43  ;;  %v381_v34 = vadd.f32 %v1977_v17, %v1974_v16 }
  0x49   : > { %3242 = vst [vmem:[#allocation30_spill] sm:$0xff] %v2141_v58  ;;  %v2174_v58 = vunpack.c.h.bf16 %v214_v55  ;;  %v373_v19 = vmax.f32 %v372_v7, %v2168_v45  ;;  %v368_v55 = vmax.f32 %v367_v2, %v2171_v24 }
  0x4a   : > { %3243 = vst [vmem:[#allocation31_spill] sm:$0xff] %v2143_v44  ;;  %v2179_v44 = vunpack.c.h.bf16 %v219_v31  ;;  %v382_v7 = vadd.f32 %v381_v34, %v1980_v18 }
  0x4b   : > { %3244 = vst [vmem:[#allocation32_spill] sm:$0xff] %v2147_v50 }
  0x4c   : > { %3245 = vst [vmem:[#allocation33_spill] sm:$0xff] %v2149_v27  ;;  %v220_v27 = vld [vmem:[%s1935_s28 + $0xf8] sm:$0xff]  ;;  %v376_v31 = vmax.f32 %v2177_v56, %v2179_v44 }
  0x4d   : > { %3246 = vst [vmem:[#allocation34_spill] sm:$0xff] %v2153_v21  ;;  %359 = vmax.xlane.f32.xlu2 %v358_v61  ;;  %v1829_v61 = vmov 0   ;;  %v2189_v62 = vunpack.c.l.bf16 %v220_v27  ;;  %v2195_v42 = vunpack.c.h.bf16 %v220_v27 }
  0x4e   : > { %3247 = vst [vmem:[#allocation35_spill] sm:$0xff] %v2158_v15  ;;  %354 = vmax.xlane.f32.xlu1 %v353_v30  ;;  %1525 = vset.pattern.permute.xlu0 %v1829_v61  ;;  %v363_v30 = vmax.f32 %v362_v63, %v2174_v58  ;;  %v401_v63 = vadd.f32 %v1948_v4, %v1946_v3 }
  0x4f   : > { %3248 = vst [vmem:[#allocation36_spill] sm:$0xff] %v2163_v29  ;;  %349 = vmax.xlane.f32.xlu0 %v348_v36  ;;  %1527 = vset.pattern.permute.xlu2 %v1829_v61  ;;  %v387_v36 = vadd.f32 %v386_v14, %v2040_v47  ;;  %v377_v2 = vmax.f32 %v376_v31, %v2189_v62 }
  0x50   : > { %3249 = vst [vmem:[#allocation37_spill] sm:$0xff] %v2168_v45  ;;  %1526 = vset.pattern.permute.xlu1 %v1829_v61  ;;  %v402_v27 = vadd.f32 %v401_v63, %v1950_v5 }
  0x51   : > { %3250 = vst [vmem:[#allocation38_spill] sm:$0xff] %v2171_v24  ;;  %v388_v61 = vadd.f32 %v387_v36, %v2053_v54  ;;  %v378_v14 = vmax.f32 %v377_v2, %v2195_v42  ;;  %v416_v36 = vadd.f32 %v2063_v60, %v2058_v57  ;;  %v411_v2 = vadd.f32 %v2071_v1, %v2069_v0 }
  0x52   : > { %3251 = vst [vmem:[#allocation39_spill] sm:$0xff] %v2174_v58  ;;  %v383_v58 = vadd.f32 %v382_v7, %v1998_v26  ;;  %v403_v31 = vadd.f32 %v402_v27, %v1959_v9 }
  0x53   : > { %3252 = vst [vmem:[#allocation40_spill] sm:$0xff] %v2177_v56  ;;  %v417_v63 = vadd.f32 %v416_v36, %v2074_v13  ;;  %v286_v36 = vld [vmem:[%s2229_s4 + $0x8] sm:$0xff]  ;;  %v3295_v45 = vld [vmem:[#allocation33_spill] sm:$0xff] }
  0x54   : > { %3253 = vst [vmem:[#allocation41_spill] sm:$0xff] %v2179_v44 }
  0x55   : > { %3254 = vst [vmem:[#allocation42_spill] sm:$0xff] %v2189_v62  ;;  %374 = vmax.xlane.f32.xlu2 %v373_v19  ;;  %v396_v19 = vadd.f32 %v2014_v33, %v2011_v32 }
  0x56   : > { %369 = vmax.xlane.f32.xlu1 %v368_v55  ;;  %3255 = vst [vmem:[#allocation43_spill] sm:$0xff] %v2195_v42  ;;  %v391_v55 = vadd.f32 %v1965_v11, %v1962_v10 }
  0x57   : > { %364 = vmax.xlane.f32.xlu0 %v363_v30  ;;  %v397_v34 = vadd.f32 %v396_v19, %v2024_v38  ;;  %v412_v19 = vadd.f32 %v411_v2, %v2080_v25  ;;  %v288_v2 = vld [vmem:[%s2229_s4 + $0x18] sm:$0xff] }
  0x58   : > { %v392_v30 = vadd.f32 %v391_v55, %v1967_v12  ;;  %v418_v55 = vadd.f32 %v417_v63, %v2093_v41  ;;  %v290_v63 = vld [vmem:[%s2229_s4 + $0x28] sm:$0xff] }
  0x59   : > { %v398_v7 = vadd.f32 %v397_v34, %v2044_v49  ;;  %v413_v27 = vadd.f32 %v412_v19, %v2101_v48  ;;  %v291_v19 = vld [vmem:[%s2229_s4 + $0x30] sm:$0xff] }
  0x5d   : > { %389 = vadd.xlane.f32.xlu2 %v388_v61  ;;  %v393_v61 = vadd.f32 %v392_v30, %v1985_v20  ;;  %v285_v30 = vld [vmem:[%s2229_s4] sm:$0xff] }
  0x5e   : > { %384 = vadd.xlane.f32.xlu1 %v383_v58  ;;  %v406_v58 = vadd.f32 %v1991_v23, %v1989_v22 }
  0x5f   : > { %379 = vmax.xlane.f32.xlu0 %v378_v14 }
  0x60   : > { %v407_v14 = vadd.f32 %v406_v58, %v2002_v28  ;;  %v295_v58 = vld [vmem:[%s2229_s4 + $0x50] sm:$0xff] }
  0x62   : > { %v408_v34 = vadd.f32 %v407_v14, %v2021_v37  ;;  %v298_v14 = vld [vmem:[%s2229_s4 + $0x68] sm:$0xff] }
  0x65   : > { %404 = vadd.xlane.f32.xlu2 %v403_v31  ;;  %v287_v31 = vld [vmem:[%s2229_s4 + $0x10] sm:$0xff] }
  0x66   : > { %399 = vadd.xlane.f32.xlu1 %v398_v7  ;;  %v292_v7 = vld [vmem:[%s2229_s4 + $0x38] sm:$0xff] }
  0x67   : > { %394 = vadd.xlane.f32.xlu0 %v393_v61  ;;  %v289_v61 = vld [vmem:[%s2229_s4 + $0x20] sm:$0xff] }
  0x6d   : > { %419 = vadd.xlane.f32.xlu2 %v418_v55  ;;  %v293_v55 = vld [vmem:[%s2229_s4 + $0x40] sm:$0xff] }
  0x6e   : > { %414 = vadd.xlane.f32.xlu1 %v413_v27  ;;  %v294_v27 = vld [vmem:[%s2229_s4 + $0x48] sm:$0xff] }
  0x6f   : > { %409 = vadd.xlane.f32.xlu0 %v408_v34  ;;  %v296_v34 = vld [vmem:[%s2229_s4 + $0x58] sm:$0xff] }
  0x83   : > { %771 = vperm.xlu0 %1525, %v285_v30   ;;  %v297_v30 = vld [vmem:[%s2229_s4 + $0x60] sm:$0xff] }
  0x85   : > { %777 = vperm.xlu2 %1527, %v287_v31  }
  0x87   : > { %774 = vperm.xlu1 %1526, %v286_v36  }
  0x8b   : > { %792 = vperm.xlu0 %1525, %v292_v7   ;;  %v299_v7 = vld [vmem:[%s2229_s4 + $0x70] sm:$0xff] }
  0x8d   : > { %780 = vperm.xlu2 %1527, %v288_v2  }
  0x8f   : > { %783 = vperm.xlu1 %1526, %v289_v61   ;;  %v300_v61 = vld [vmem:[%s2229_s4 + $0x78] sm:$0xff] }
  0x93   : > { %801 = vperm.xlu0 %1525, %v295_v58  }
  0x95   : > { %786 = vperm.xlu2 %1527, %v290_v63  }
  0x97   : > { %789 = vperm.xlu1 %1526, %v291_v19  }
  0x9b   : > { %810 = vperm.xlu0 %1525, %v298_v14  }
  0x9d   : > { %795 = vperm.xlu2 %1527, %v293_v55  }
  0x9f   : > { %798 = vperm.xlu1 %1526, %v294_v27  }
  0xa5   : > { %804 = vperm.xlu2 %1527, %v296_v34  }
  0xa7   : > { %807 = vperm.xlu1 %1526, %v297_v30  }
  0xa8   : > { %v2245_v31 = vpop.xlane.xlu2 %324 }
  0xa9   : > { %3256 = vst [vmem:[#allocation44_spill] sm:$0xff] %v2245_v31  ;;  %v2250_v2 = vpop.xlane.xlu1 %314  ;;  %v477_v44 = vsub.f32 %v1946_v3, %v2245_v31  ;;  %v478_v56 = vsub.f32 %v1948_v4, %v2245_v31 }
  0xaa   : > { %v2247_v36 = vpop.xlane.xlu0 %304  ;;  %3258 = vst [vmem:[#allocation46_spill] sm:$0xff] %v2250_v2  ;;  %v469_v3 = vsub.f32 %v1962_v10, %v2250_v2 }
  0xab   : > { %3257 = vst [vmem:[#allocation45_spill] sm:$0xff] %v2247_v36  ;;  %v461_v27 = vsub.f32 %v1974_v16, %v2247_v36  ;;  %v462_v34 = vsub.f32 %v1977_v17, %v2247_v36  ;;  %v463_v42 = vsub.f32 %v1980_v18, %v2247_v36  ;;  %v479_v17 = vsub.f32 %v1950_v5, %v2245_v31 }
  0xac   : > { %v464_v18 = vsub.f32 %v1998_v26, %v2247_v36  ;;  %v470_v26 = vsub.f32 %v1965_v11, %v2250_v2  ;;  %v541_v10 = vmul.f32 1.442695, %v469_v3 }
  0xad   : > { %813 = vperm.xlu2 %1527, %v299_v7   ;;  %v527_v62 = vmul.f32 1.442695, %v462_v34  ;;  %v529_v16 = vmul.f32 1.442695, %v463_v42  ;;  %v557_v34 = vmul.f32 1.442695, %v477_v44  ;;  %v471_v44 = vsub.f32 %v1967_v12, %v2250_v2 }
  0xae   : > { %v561_v42 = vmul.f32 1.442695, %v479_v17  ;;  %v531_v36 = vmul.f32 1.442695, %v464_v18  ;;  %v543_v18 = vmul.f32 1.442695, %v470_v26 }
  0xaf   : > { %816 = vperm.xlu1 %1526, %v300_v61   ;;  %v525_v61 = vmul.f32 1.442695, %v461_v27  ;;  %v545_v3 = vmul.f32 1.442695, %v471_v44 }
  0xb0   : > { %v2253_v58 = vpop.xlane.xlu2 %329 }
  0xb1   : > { %v2257_v19 = vpop.xlane.xlu1 %319  ;;  %1528 = vpow2.f32 %v525_v61  ;;  %v559_v61 = vmul.f32 1.442695, %v478_v56  ;;  %v481_v56 = vsub.f32 %v1989_v22, %v2253_v58  ;;  %v483_v22 = vsub.f32 %v2002_v28, %v2253_v58 }
  0xb2   : > { %v2255_v63 = vpop.xlane.xlu0 %309  ;;  %3260 = vst [vmem:[#allocation48_spill] sm:$0xff] %v2257_v19  ;;  %1530 = vpow2.f32 %v527_v62  ;;  %v475_v28 = vsub.f32 %v2024_v38, %v2257_v19 }
  0xb3   : > { %3259 = vst [vmem:[#allocation47_spill] sm:$0xff] %v2255_v63  ;;  %1532 = vpow2.f32 %v529_v16  ;;  %v465_v4 = vsub.f32 %v2032_v43, %v2255_v63  ;;  %v466_v5 = vsub.f32 %v2037_v46, %v2255_v63  ;;  %v467_v16 = vsub.f32 %v2040_v47, %v2255_v63 }
  0xb4   : > { %1534 = vpow2.f32 %v557_v34  ;;  %v482_v34 = vsub.f32 %v1991_v23, %v2253_v58  ;;  %v473_v47 = vsub.f32 %v2011_v32, %v2257_v19  ;;  %v474_v23 = vsub.f32 %v2014_v33, %v2257_v19 }
  0xb5   : > { %1536 = vpow2.f32 %v559_v61  ;;  %v533_v43 = vmul.f32 1.442695, %v465_v4  ;;  %v535_v46 = vmul.f32 1.442695, %v466_v5  ;;  %v565_v61 = vmul.f32 1.442695, %v481_v56 }
  0xb6   : > { %1538 = vpow2.f32 %v561_v42  ;;  %v567_v5 = vmul.f32 1.442695, %v482_v34  ;;  %v569_v32 = vmul.f32 1.442695, %v483_v22  ;;  %v468_v44 = vsub.f32 %v2053_v54, %v2255_v63 }
  0xb7   : > { %v1529_v62 = vpop.eup %1528  ;;  %1540 = vpow2.f32 %v531_v36  ;;  %v537_v36 = vmul.f32 1.442695, %v467_v16  ;;  %v472_v33 = vsub.f32 %v1985_v20, %v2250_v2  ;;  %v549_v56 = vmul.f32 1.442695, %v473_v47 }
  0xb8   : > { %v2259_v14 = vpop.xlane.xlu2 %344  ;;  %v1531_v24 = vpop.eup %1530  ;;  %1542 = vpow2.f32 %v541_v10  ;;  %v551_v16 = vmul.f32 1.442695, %v474_v23  ;;  %v553_v54 = vmul.f32 1.442695, %v475_v28  ;;  %v476_v23 = vsub.f32 %v2044_v49, %v2257_v19  ;;  %v3277_v19 = vld [vmem:[#allocation26_spill] sm:$0xff] }
  0xb9   : > { %v2267_v30 = vpop.xlane.xlu1 %339  ;;  %v653_v17 = vadd.f32 %v1531_v24, %v1529_v62  ;;  %v1533_v11 = vpop.eup %1532  ;;  %1544 = vpow2.f32 %v533_v43  ;;  %v494_v20 = vsub.f32 %v2049_v52, %v2259_v14  ;;  %v495_v22 = vsub.f32 %v2061_v59, %v2259_v14 }
  0xba   : > { %v2261_v55 = vpop.xlane.xlu0 %334  ;;  %3261 = vst [vmem:[#allocation49_spill] sm:$0xff] %v2267_v30  ;;  %v2313_v4 = vpop.eup %1534  ;;  %1546 = vpow2.f32 %v535_v46  ;;  %v493_v46 = vsub.f32 %v2047_v51, %v2259_v14  ;;  %v3307_v51 = vld [vmem:[#allocation14_spill] sm:$0xff] }
  0xbb   : > { %v654_v62 = vadd.f32 %v1533_v11, %v653_v17  ;;  %v2317_v42 = vpop.eup %1536  ;;  %1548 = vpow2.f32 %v543_v18  ;;  %v591_v49 = vmul.f32 1.442695, %v494_v20  ;;  %v487_v20 = vsub.f32 %v2080_v25, %v2261_v55 }
  0xbc   : > { %v2321_v26 = vpop.eup %1538  ;;  %1550 = vpow2.f32 %v545_v3 }
  0xbd   : > { %v1541_v10 = vpop.eup %1540  ;;  %1552 = vpow2.f32 %v565_v61  ;;  %v539_v61 = vmul.f32 1.442695, %v468_v44  ;;  %v491_v44 = vsub.f32 %v2074_v13, %v2267_v30 }
  0xbe   : > { %v1543_v43 = vpop.eup %1542  ;;  %1554 = vpow2.f32 %v537_v36  ;;  %v655_v38 = vadd.f32 %v1541_v10, %v654_v62  ;;  %v489_v36 = vsub.f32 %v2058_v57, %v2267_v30  ;;  %v589_v10 = vmul.f32 1.442695, %v493_v46 }
  0xbf   : > { %v1545_v11 = vpop.eup %1544  ;;  %1556 = vpow2.f32 %v567_v5  ;;  %v547_v5 = vmul.f32 1.442695, %v472_v33  ;;  %v593_v46 = vmul.f32 1.442695, %v495_v22  ;;  %v585_v22 = vmul.f32 1.442695, %v491_v44 }
  0xc0   : > { %v2269_v7 = vpop.xlane.xlu2 %359  ;;  %v1547_v34 = vpop.eup %1546  ;;  %1558 = vpow2.f32 %v569_v32  ;;  %v490_v32 = vsub.f32 %v2063_v60, %v2267_v30  ;;  %v581_v13 = vmul.f32 1.442695, %v489_v36  ;;  %v577_v44 = vmul.f32 1.442695, %v487_v20 }
  0xc1   : > { %v2285_v27 = vpop.xlane.xlu1 %354  ;;  %v1549_v47 = vpop.eup %1548  ;;  %1560 = vpow2.f32 %v549_v56  ;;  %v485_v56 = vsub.f32 %v2069_v0, %v2261_v55  ;;  %v658_v3 = vadd.f32 %v1547_v34, %v1545_v11  ;;  %v505_v25 = vsub.f32 %v2089_v39, %v2269_v7 }
  0xc2   : > { %v2277_v29 = vpop.xlane.xlu0 %349  ;;  %v1551_v28 = vpop.eup %1550  ;;  %1562 = vpow2.f32 %v551_v16  ;;  %v663_v60 = vadd.f32 %v1549_v47, %v1543_v43  ;;  %v583_v34 = vmul.f32 1.442695, %v490_v32  ;;  %v506_v11 = vsub.f32 %v2091_v40, %v2269_v7  ;;  %v3271_v47 = vld [vmem:[#allocation21_spill] sm:$0xff] }
  0xc3   : > { %1564 = vpow2.f32 %v553_v54  ;;  %v486_v54 = vsub.f32 %v2071_v1, %v2261_v55  ;;  %v573_v1 = vmul.f32 1.442695, %v485_v56  ;;  %v613_v20 = vmul.f32 1.442695, %v505_v25  ;;  %v3275_v25 = vld [vmem:[#allocation23_spill] sm:$0xff] }
  0xc4   : > { %1566 = vpow2.f32 %v539_v61  ;;  %v615_v56 = vmul.f32 1.442695, %v506_v11  ;;  %v3276_v11 = vsub.f32 %v1959_v9, %v2245_v31  ;;  %v499_v9 = vsub.f32 %v3277_v19, %v2277_v29 }
  0xc5   : > { %656 = vadd.xlane.f32.xlu0 %v655_v38  ;;  %v2349_v38 = vpop.eup %1552  ;;  %1568 = vpow2.f32 %v547_v5  ;;  %v664_v5 = vadd.f32 %v1551_v28, %v663_v60  ;;  %v575_v32 = vmul.f32 1.442695, %v486_v54  ;;  %v3270_v28 = vld [vmem:[#allocation20_spill] sm:$0xff] }
  0xc6   : > { %v1555_v33 = vpop.eup %1554  ;;  %1570 = vpow2.f32 %v589_v10  ;;  %v555_v10 = vmul.f32 1.442695, %v476_v23  ;;  %v501_v23 = vsub.f32 %v3270_v28, %v2285_v27 }
  0xc7   : > { %v2357_v18 = vpop.eup %1556  ;;  %1572 = vpow2.f32 %v591_v49  ;;  %v659_v36 = vadd.f32 %v1555_v33, %v658_v3  ;;  %v507_v3 = vsub.f32 %v2111_v6, %v2269_v7 }
  0xc8   : > { %v2281_v50 = vpop.xlane.xlu2 %374  ;;  %v2363_v0 = vpop.eup %1558  ;;  %1574 = vpow2.f32 %v593_v46 }
  0xc9   : > { %3262 = vst [vmem:[#allocation50_spill] sm:$0xff] %v2281_v50  ;;  %v2311_v24 = vpop.xlane.xlu1 %369  ;;  %v1561_v43 = vpop.eup %1560  ;;  %1576 = vpow2.f32 %v581_v13  ;;  %v765_v13 = vlaneseq }
  0xca   : > { %v2305_v12 = vpop.xlane.xlu0 %364  ;;  %3264 = vst [vmem:[#allocation52_spill] sm:$0xff] %v2311_v24  ;;  %v1563_v16 = vpop.eup %1562  ;;  %1578 = vpow2.f32 %v583_v34  ;;  %v502_v34 = vsub.f32 %v3271_v47, %v2285_v27 }
  0xcb   : > { %1580 = vpow2.f32 %v585_v22  ;;  %v668_v60 = vadd.f32 %v1563_v16, %v1561_v43  ;;  %v3273_v22 = vld [vmem:[#allocation22_spill] sm:$0xff] }
  0xcc   : > { %1582 = vpow2.f32 %v555_v10 }
  0xcd   : > { %1584 = vpow2.f32 %v573_v1  ;;  %v563_v1 = vmul.f32 1.442695, %v3276_v11 }
  0xce   : > { %1586 = vpow2.f32 %v575_v32 }
  0xcf   : > { %1588 = vpow2.f32 %v577_v44  ;;  %v3278_v44 = vld [vmem:[#allocation31_spill] sm:$0xff] }
  0xd0   : > { %v2301_v15 = vpop.xlane.xlu2 %389  ;;  %1590 = vpow2.f32 %v613_v20 }
  0xd1   : > { %3263 = vst [vmem:[#allocation51_spill] sm:$0xff] %v2301_v15  ;;  %v2353_v57 = vpop.xlane.xlu1 %384  ;;  %v3272_v15 = vld [vmem:[#allocation25_spill] sm:$0xff]  ;;  %1592 = vpow2.f32 %v615_v56 }
  0xd2   : > { %v2343_v62 = vpop.xlane.xlu0 %379  ;;  %3267 = vst [vmem:[#allocation55_spill] sm:$0xff] %v2353_v57  ;;  %v503_v63 = vsub.f32 %v3272_v15, %v2285_v27  ;;  %1594 = vpow2.f32 %v563_v1  ;;  %v601_v1 = vmul.f32 1.442695, %v499_v9  ;;  %v3283_v15 = vld [vmem:[#allocation30_spill] sm:$0xff] }
  0xd3   : > { %3266 = vst [vmem:[#allocation54_spill] sm:$0xff] %v2343_v62  ;;  %v514_v47 = vsub.f32 %v3283_v15, %v2311_v24 }
  0xd4   : > { %v609_v31 = vmul.f32 1.442695, %v503_v63 }
  0xd8   : > { %v2329_v17 = vpop.xlane.xlu2 %404 }
  0xd9   : > { %3265 = vst [vmem:[#allocation53_spill] sm:$0xff] %v2329_v17  ;;  %v1565_v17 = vpop.eup %1564  ;;  %v2393_v16 = vpop.xlane.xlu1 %399 }
  0xda   : > { %v2375_v49 = vpop.xlane.xlu0 %394  ;;  %3274 = vst [vmem:[#allocation58_spill] sm:$0xff] %v2393_v16  ;;  %v669_v57 = vadd.f32 %v1565_v17, %v668_v60  ;;  %v2408_v16 = vand.u32 127, %v765_v13  ;;  %v3279_v60 = vld [vmem:[#allocation27_spill] sm:$0xff] }
  0xdb   : > { %3269 = vst [vmem:[#allocation57_spill] sm:$0xff] %v2375_v49  ;;  %v517_v13 = vsub.f32 %v3279_v60, %v2281_v50  ;;  %v2472_v60 = vmul.f32 1.442695, %v514_v47 }
  0xdc   : > { %v2429_v63 = vadd.s32 128, %v2408_v16  ;;  %v2432_v56 = vadd.s32 256, %v2408_v16 }
  0xdd   : > { %v2453_v9 = vmul.f32 1.442695, %v517_v13 }
  0xe0   : > { %v2367_v61 = vpop.xlane.xlu2 %419 }
  0xe1   : > { %3268 = vst [vmem:[#allocation56_spill] sm:$0xff] %v2367_v61  ;;  %v1567_v61 = vpop.eup %1566 }
  0xe2   : > { %v1569_v33 = vpop.eup %1568  ;;  %v660_v46 = vadd.f32 %v1567_v61, %v659_v36  ;;  %v497_v61 = vsub.f32 %v3273_v22, %v2277_v29  ;;  %v617_v36 = vmul.f32 1.442695, %v507_v3  ;;  %v605_v3 = vmul.f32 1.442695, %v501_v23  ;;  %v2426_v39 = vpop.xlane.xlu0 %409 }
  0xe3   : > { %v2383_v54 = vpop.eup %1570  ;;  %v665_v49 = vadd.f32 %v1569_v33, %v664_v5  ;;  %v498_v5 = vsub.f32 %v3275_v25, %v2277_v29  ;;  %v673_v23 = vadd.f32 %v2317_v42, %v2313_v4  ;;  %3280 = vst [vmem:[#allocation31_spill] sm:$0xff] %v2426_v39  ;;  %v3281_v4 = vld [vmem:[#allocation28_spill] sm:$0xff]  ;;  %v2460_v39 = vpop.xlane.xlu1 %414 }
  0xe4   : > { %v2387_v2 = vpop.eup %1572  ;;  %661 = vadd.xlane.f32.xlu2 %v660_v46  ;;  %v597_v40 = vmul.f32 1.442695, %v497_v61  ;;  %v2435_v61 = vadd.s32 384, %v2408_v16  ;;  %1596 = vpow2.f32 %v617_v36  ;;  %v518_v42 = vsub.f32 %v3281_v4, %v2281_v50  ;;  %v3285_v4 = vld [vmem:[#allocation35_spill] sm:$0xff]  ;;  %3287 = vst [vmem:[#allocation61_spill] sm:$0xff] %v2460_v39 }
  0xe5   : > { %v2395_v43 = vpop.eup %1574  ;;  %666 = vadd.xlane.f32.xlu1 %v665_v49  ;;  %v607_v49 = vmul.f32 1.442695, %v502_v34  ;;  %v2418_v17 = vmul.f32 1.442695, %v498_v5  ;;  %1598 = vpow2.f32 %v605_v3  ;;  %v674_v3 = vadd.f32 %v2321_v26, %v673_v23  ;;  %v3290_v39 = vld [vmem:[#allocation11_spill] sm:$0xff]  ;;  %v3293_v26 = vld [vmem:[#allocation12_spill] sm:$0xff] }
  0xe6   : > { %v2404_v33 = vpop.eup %1576  ;;  %v2466_v13 = vmul.f32 1.442695, %v518_v42  ;;  %v3292_v42 = vld [vmem:[#allocation32_spill] sm:$0xff]  ;;  %v510_v50 = vsub.f32 %v3295_v45, %v2305_v12  ;;  %v3299_v45 = vld [vmem:[#allocation39_spill] sm:$0xff] }
  0xe7   : > { %v2410_v32 = vpop.eup %1578  ;;  %1600 = vpow2.f32 %v607_v49 }
  0xe8   : > { %v2402_v10 = vpop.permute.xlu2 %777  ;;  %v2414_v11 = vpop.eup %1580  ;;  %1602 = vpow2.f32 %v609_v31  ;;  %3288 = vst [vmem:[#allocation62_spill] sm:$0xff] %v2466_v13 }
  0xe9   : > { %v1583_v46 = vpop.eup %1582  ;;  %vm826_vm5 = vcmp.eq.s32.totalorder %v2408_v16, %v2402_v10  ;;  %vm827_vm6 = vcmp.eq.s32.totalorder %v2429_v63, %v2402_v10  ;;  %1604 = vpow2.f32 %v597_v40  ;;  %vm828_vm13 = vcmp.eq.s32.totalorder %v2432_v56, %v2402_v10 }
  0xea   : > { %v2424_v20 = vpop.eup %1584  ;;  %v670_v34 = vadd.f32 %v1583_v46, %v669_v57  ;;  %v3282_v57 = vld [vmem:[#allocation29_spill] sm:$0xff]  ;;  %vm2498_vm8 = vmpackc.low %vm827_vm6, %vm826_vm5  ;;  %vm829_vm14 = vcmp.eq.s32.totalorder %v2435_v61, %v2402_v10  ;;  %1606 = vpow2.f32 %v2418_v17 }
  0xeb   : > { %v2437_v5 = vpop.eup %1586  ;;  %v513_v46 = vsub.f32 %v3282_v57, %v2311_v24  ;;  %v515_v57 = vsub.f32 %v3285_v4, %v2311_v24  ;;  %v509_v4 = vsub.f32 %v3292_v42, %v2305_v12  ;;  %1608 = vpow2.f32 %v601_v1  ;;  %vm2531_vm5 = vmpackc.low %vm829_vm14, %vm828_vm13  ;;  %v3304_v1 = vld [vmem:[#allocation8_spill] sm:$0xff] }
  0xec   : > { %v2443_v6 = vpop.eup %1588  ;;  %671 = vadd.xlane.f32.xlu2 %v670_v34  ;;  %1610 = vpow2.f32 %v2453_v9 }
  0xed   : > { %v2451_v36 = vpop.eup %1590  ;;  %v2470_v23 = vmul.f32 1.442695, %v513_v46  ;;  %v2486_v22 = vmul.f32 1.442695, %v515_v57  ;;  %v621_v24 = vmul.f32 1.442695, %v509_v4 }
  0xee   : > { %3284 = vst [vmem:[#allocation59_spill] sm:$0xff] %v2451_v36  ;;  %v2458_v19 = vpop.eup %1592  ;;  %v918_v4 = vsel %vm2498_vm8, %v3304_v1, 0 }
  0xef   : > { %3286 = vst [vmem:[#allocation60_spill] sm:$0xff] %v2458_v19  ;;  %v1595_v49 = vpop.eup %1594 }
  0xf0   : > { %v781_v28 = vpop.permute.xlu2 %780  ;;  %v2479_v31 = vpop.eup %1596  ;;  %3294 = vst [vmem:[#allocation12_spill] sm:$0xff] %v2486_v22  ;;  %v675_v21 = vadd.f32 %v1595_v49, %v674_v3  ;;  %v3298_v49 = vld [vmem:[#allocation36_spill] sm:$0xff] }
  0xf1   : > { %vm830_vm0 = vcmp.eq.s32.totalorder %v2408_v16, %v781_v28  ;;  %vm831_vm1 = vcmp.eq.s32.totalorder %v2429_v63, %v781_v28  ;;  %vm832_vm2 = vcmp.eq.s32.totalorder %v2432_v56, %v781_v28  ;;  %vm833_vm3 = vcmp.eq.s32.totalorder %v2435_v61, %v781_v28  ;;  %3291 = vst [vmem:[#allocation11_spill] sm:$0xff] %v2479_v31  ;;  %v2484_v47 = vpop.eup %1598 }
  0xf2   : > { %vm888_vm4 = vmpackc.low %vm831_vm1, %vm830_vm0  ;;  %v2490_v13 = vpop.eup %1600 }
  0xf3   : > { %v920_v28 = vsel %vm888_vm4, %v3290_v39, 0  ;;  %vm889_vm7 = vmpackc.low %vm833_vm3, %vm832_vm2  ;;  %v2510_v3 = vpop.eup %1602 }
  0xf4   : > { %v921_v46 = vsel %vm889_vm7, %v3293_v26, 0  ;;  %v958_v15 = vunpack.c.l.bf16 %v920_v28  ;;  %v959_v25 = vunpack.c.h.bf16 %v920_v28  ;;  %676 = vadd.xlane.f32.xlu2 %v675_v21  ;;  %v511_v28 = vsub.f32 %v3298_v49, %v2305_v12  ;;  %v3300_v21 = vld [vmem:[#allocation9_spill] sm:$0xff] }
  0xf5   : > { %v772_v39 = vpop.permute.xlu0 %771  ;;  %v960_v40 = vunpack.c.l.bf16 %v921_v46  ;;  %v961_v22 = vunpack.c.h.bf16 %v921_v46  ;;  %v688_v49 = vadd.f32 %v2410_v32, %v2404_v33 }
  0xf6   : > { %vm818_vm9 = vcmp.eq.s32.totalorder %v2408_v16, %v772_v39  ;;  %vm819_vm10 = vcmp.eq.s32.totalorder %v2429_v63, %v772_v39  ;;  %vm820_vm11 = vcmp.eq.s32.totalorder %v2432_v56, %v772_v39  ;;  %vm821_vm12 = vcmp.eq.s32.totalorder %v2435_v61, %v772_v39  ;;  %v3306_v39 = vld [vmem:[#allocation13_spill] sm:$0xff] }
  0xf7   : > { %vm882_vm15 = vmpackc.low %vm819_vm10, %vm818_vm9  ;;  %v1025_v57 = vadd.f32 %v959_v25, %v958_v15  ;;  %v3301_v15 = vsub.f32 %v2093_v41, %v2267_v30  ;;  %v2535_v41 = vpop.eup %1604  ;;  %v689_v36 = vadd.f32 %v2414_v11, %v688_v49  ;;  %v3311_v11 = vsub.f32 %v2101_v48, %v2261_v55  ;;  %v1689_v48 = vld [vmem:[%s1935_s28 + $0x40] sm:$0xff] }
  0xf8   : > { %v914_v42 = vsel %vm882_vm15, %v3300_v21, 0  ;;  %vm883_vm0 = vmpackc.low %vm821_vm12, %vm820_vm11  ;;  %v2545_v1 = vpop.eup %1606 }
  0xf9   : > { %v775_v34 = vpop.permute.xlu1 %774  ;;  %v587_v25 = vmul.f32 1.442695, %v3301_v15  ;;  %v1026_v46 = vadd.f32 %v1025_v57, %v960_v40  ;;  %v946_v15 = vunpack.c.l.bf16 %v914_v42  ;;  %v947_v30 = vunpack.c.h.bf16 %v914_v42  ;;  %v1688_v57 = vld [vmem:[%s1935_s28 + $0x28] sm:$0xff]  ;;  %v2553_v42 = vpop.eup %1608 }
  0xfa   : > { %vm822_vm1 = vcmp.eq.s32.totalorder %v2408_v16, %v775_v34  ;;  %vm823_vm2 = vcmp.eq.s32.totalorder %v2429_v63, %v775_v34  ;;  %vm824_vm3 = vcmp.eq.s32.totalorder %v2432_v56, %v775_v34  ;;  %vm825_vm4 = vcmp.eq.s32.totalorder %v2435_v61, %v775_v34  ;;  %v3305_v34 = vld [vmem:[#allocation10_spill] sm:$0xff] }
  0xfb   : > { %vm884_vm6 = vmpackc.low %vm823_vm2, %vm822_vm1  ;;  %v915_v21 = vsel %vm883_vm0, %v3305_v34, 0  ;;  %v1027_v59 = vadd.f32 %v1026_v46, %v961_v22  ;;  %1612 = vpow2.f32 %v587_v25  ;;  %v2551_v9 = vsel %vm2531_vm5, %v1688_v57, 0  ;;  %v2555_v34 = vpop.permute.xlu2 %786 }
  0xfc   : > { %v916_v10 = vsel %vm884_vm6, %v3306_v39, 0  ;;  %vm885_vm7 = vmpackc.low %vm825_vm4, %vm824_vm3  ;;  %v948_v62 = vunpack.c.l.bf16 %v915_v21  ;;  %v954_v39 = vunpack.c.l.bf16 %v918_v4  ;;  %v949_v22 = vunpack.c.h.bf16 %v915_v21 }
  0xfd   : > { %v950_v52 = vunpack.c.l.bf16 %v916_v10  ;;  %v951_v26 = vunpack.c.h.bf16 %v916_v10  ;;  %v917_v40 = vsel %vm885_vm7, %v3307_v51, 0  ;;  %1028 = vadd.xlane.f32.xlu2 %v1027_v59  ;;  %v1010_v33 = vadd.f32 %v947_v30, %v946_v15  ;;  %v2563_v59 = vpop.eup %1610 }
  0xfe   : > { %v955_v46 = vunpack.c.h.bf16 %v918_v4  ;;  %1614 = vpow2.f32 %v2470_v23  ;;  %v623_v10 = vmul.f32 1.442695, %v510_v50  ;;  %v625_v51 = vmul.f32 1.442695, %v511_v28 }
  0xff   : > { %v1015_v32 = vadd.f32 %v951_v26, %v950_v52  ;;  %v3308_v25 = vsub.f32 %v2021_v37, %v2253_v58  ;;  %1616 = vpow2.f32 %v2472_v60  ;;  %v1011_v57 = vadd.f32 %v1010_v33, %v948_v62 }
 0x100   : > { %v952_v19 = vunpack.c.l.bf16 %v917_v40  ;;  %1618 = vpow2.f32 %v621_v24  ;;  %v956_v52 = vunpack.c.l.bf16 %v2551_v9  ;;  %v953_v30 = vunpack.c.h.bf16 %v917_v40 }
 0x101   : > { %v571_v17 = vmul.f32 1.442695, %v3308_v25  ;;  %v784_v31 = vpop.permute.xlu1 %783  ;;  %v1012_v50 = vadd.f32 %v1011_v57, %v949_v22  ;;  %v1020_v60 = vadd.f32 %v955_v46, %v954_v39  ;;  %v1613_v23 = vpop.eup %1612  ;;  %v678_v24 = vadd.f32 %v2357_v18, %v2349_v38 }
 0x102   : > { %vm834_vm8 = vcmp.eq.s32.totalorder %v2408_v16, %v784_v31  ;;  %vm835_vm9 = vcmp.eq.s32.totalorder %v2429_v63, %v784_v31  ;;  %v1016_v62 = vadd.f32 %v1015_v32, %v952_v19  ;;  %v579_v49 = vmul.f32 1.442695, %v3311_v11  ;;  %v2583_v19 = vpop.permute.xlu0 %792 }
 0x103   : > { %vm2568_vm10 = vmpackc.low %vm835_vm9, %vm834_vm8  ;;  %1620 = vpow2.f32 %v571_v17  ;;  %v683_v28 = vadd.f32 %v2437_v5, %v2424_v20  ;;  %vm838_vm11 = vcmp.eq.s32.totalorder %v2408_v16, %v2555_v34  ;;  %vm839_vm12 = vcmp.eq.s32.totalorder %v2429_v63, %v2555_v34  ;;  %1013 = vadd.xlane.f32.xlu0 %v1012_v50  ;;  %v2622_v32 = vpop.permute.xlu2 %795 }
 0x104   : > { %v1017_v4 = vadd.f32 %v1016_v62, %v953_v30  ;;  %v690_v21 = vadd.f32 %v1613_v23, %v689_v36  ;;  %v2585_v15 = vpop.eup %1614  ;;  %1622 = vpow2.f32 %v623_v10  ;;  %vm836_vm13 = vcmp.eq.s32.totalorder %v2432_v56, %v784_v31  ;;  %vm2607_vm1 = vmpackc.low %vm839_vm12, %vm838_vm11 }
 0x105   : > { %vm837_vm14 = vcmp.eq.s32.totalorder %v2435_v61, %v784_v31  ;;  %v922_v18 = vsel %vm2568_vm10, %v1689_v48, 0  ;;  %v2592_v38 = vpop.eup %1616  ;;  %vm840_vm15 = vcmp.eq.s32.totalorder %v2432_v56, %v2555_v34  ;;  %vm841_vm0 = vcmp.eq.s32.totalorder %v2435_v61, %v2555_v34  ;;  %v1690_v34 = vld [vmem:[%s1935_s28 + $0x50] sm:$0xff]  ;;  %v1694_v48 = vld [vmem:[%s1935_s28 + $0x58] sm:$0xff] }
 0x106   : > { %1018 = vadd.xlane.f32.xlu1 %v1017_v4  ;;  %691 = vadd.xlane.f32.xlu2 %v690_v21  ;;  %v957_v20 = vunpack.c.h.bf16 %v2551_v9  ;;  %v1021_v5 = vadd.f32 %v1020_v60, %v956_v52  ;;  %v2599_v36 = vpop.eup %1618  ;;  %1624 = vpow2.f32 %v579_v49  ;;  %v684_v40 = vadd.f32 %v2443_v6, %v683_v28  ;;  %vm2629_vm2 = vmpackc.low %vm837_vm14, %vm836_vm13  ;;  %v1691_v60 = vld [vmem:[%s1935_s28 + $0x60] sm:$0xff]  ;;  %v1693_v4 = vld [vmem:[%s1935_s28 + $0x68] sm:$0xff] }
 0x107   : > { %v3314_v39 = vsub.f32 %v2135_v53, %v2285_v27  ;;  %v3315_v22 = vsub.f32 %v3278_v44, %v2277_v29  ;;  %1626 = vpow2.f32 %v625_v51  ;;  %v679_v10 = vadd.f32 %v2363_v0, %v678_v24  ;;  %vm2643_vm7 = vmpackc.low %vm841_vm0, %vm840_vm15  ;;  %v1692_v24 = vld [vmem:[%s1935_s28 + $0x48] sm:$0xff] }
 0x108   : > { %v962_v25 = vunpack.c.l.bf16 %v922_v18  ;;  %v963_v17 = vunpack.c.h.bf16 %v922_v18  ;;  %v1022_v31 = vadd.f32 %v1021_v5, %v957_v20  ;;  %v3320_v51 = vsub.f32 %v2086_v35, %v2259_v14 }
 0x109   : > { %v2615_v9 = vmul.f32 1.442695, %v3314_v39  ;;  %v2620_v33 = vmul.f32 1.442695, %v3315_v22  ;;  %v790_v46 = vpop.permute.xlu1 %789  ;;  %v1621_v57 = vpop.eup %1620  ;;  %v703_v50 = vadd.f32 %v2490_v13, %v2484_v47  ;;  %v2654_v37 = vadd.f32 %v2545_v1, %v2535_v41 }
 0x10a   : > { %vm842_vm3 = vcmp.eq.s32.totalorder %v2408_v16, %v790_v46  ;;  %vm843_vm4 = vcmp.eq.s32.totalorder %v2429_v63, %v790_v46  ;;  %vm844_vm5 = vcmp.eq.s32.totalorder %v2432_v56, %v790_v46  ;;  %vm845_vm6 = vcmp.eq.s32.totalorder %v2435_v61, %v790_v46  ;;  %v2656_v30 = vpop.eup %1622 }
 0x10b   : > { %vm894_vm8 = vmpackc.low %vm843_vm4, %vm842_vm3  ;;  %v595_v52 = vmul.f32 1.442695, %v3320_v51  ;;  %v924_v62 = vsel %vm2607_vm1, %v1690_v34, 0  ;;  %v923_v11 = vsel %vm2629_vm2, %v1692_v24, 0  ;;  %v693_v13 = vadd.f32 %v2387_v2, %v2383_v54  ;;  %1023 = vadd.xlane.f32.xlu0 %v1022_v31  ;;  %v2681_v54 = vpop.permute.xlu0 %801  ;;  %v2707_v31 = vpop.permute.xlu2 %804  ;;  %v1700_v51 = vld [vmem:[%s1935_s28 + $0xa0] sm:$0xff] }
 0x10c   : > { %v926_v23 = vsel %vm894_vm8, %v1691_v60, 0  ;;  %vm895_vm9 = vmpackc.low %vm845_vm6, %vm844_vm5  ;;  %v680_v47 = vadd.f32 %v1621_v57, %v679_v10  ;;  %v1030_v41 = vadd.f32 %v963_v17, %v962_v25  ;;  %v1625_v28 = vpop.eup %1624  ;;  %vm846_vm10 = vcmp.eq.s32.totalorder %v2408_v16, %v2583_v19 }
 0x10d   : > { %v970_v1 = vunpack.c.l.bf16 %v926_v23  ;;  %v971_v49 = vunpack.c.h.bf16 %v926_v23  ;;  %vm847_vm11 = vcmp.eq.s32.totalorder %v2429_v63, %v2583_v19  ;;  %v927_v21 = vsel %vm895_vm9, %v1693_v4, 0  ;;  %v2679_v2 = vpop.eup %1626 }
 0x10e   : > { %v2677_v18 = vsel %vm2643_vm7, %v1694_v48, 0  ;;  %681 = vadd.xlane.f32.xlu1 %v680_v47  ;;  %v964_v20 = vunpack.c.l.bf16 %v923_v11  ;;  %v966_v26 = vunpack.c.l.bf16 %v924_v62  ;;  %v967_v39 = vunpack.c.h.bf16 %v924_v62  ;;  %vm2696_vm12 = vmpackc.low %vm847_vm11, %vm846_vm10  ;;  %v1695_v62 = vld [vmem:[%s1935_s28 + $0x70] sm:$0xff] }
 0x10f   : > { %v1040_v5 = vadd.f32 %v971_v49, %v970_v1  ;;  %1628 = vpow2.f32 %v595_v52  ;;  %v694_v22 = vadd.f32 %v2395_v43, %v693_v13  ;;  %v2685_v46 = vadd.f32 %v2510_v3, %v703_v50 }
 0x110   : > { %v3321_v10 = vsub.f32 %v3299_v45, %v2305_v12  ;;  %vm850_vm13 = vcmp.eq.s32.totalorder %v2408_v16, %v2622_v32  ;;  %v685_v43 = vadd.f32 %v1625_v28, %v684_v40  ;;  %v1031_v17 = vadd.f32 %v1030_v41, %v964_v20 }
 0x111   : > { %v799_v3 = vpop.permute.xlu1 %798  ;;  %v972_v57 = vunpack.c.l.bf16 %v927_v21  ;;  %vm851_vm14 = vcmp.eq.s32.totalorder %v2429_v63, %v2622_v32  ;;  %v968_v0 = vunpack.c.l.bf16 %v2677_v18  ;;  %v965_v40 = vunpack.c.h.bf16 %v923_v11 }
 0x112   : > { %v627_v6 = vmul.f32 1.442695, %v3321_v10  ;;  %vm854_vm15 = vcmp.eq.s32.totalorder %v2408_v16, %v799_v3  ;;  %vm855_vm0 = vcmp.eq.s32.totalorder %v2429_v63, %v799_v3  ;;  %v973_v52 = vunpack.c.h.bf16 %v927_v21  ;;  %vm2731_vm4 = vmpackc.low %vm851_vm14, %vm850_vm13  ;;  %v1698_v10 = vld [vmem:[%s1935_s28 + $0x78] sm:$0xff] }
 0x113   : > { %vm2709_vm1 = vmpackc.low %vm855_vm0, %vm854_vm15  ;;  %v1041_v50 = vadd.f32 %v1040_v5, %v972_v57  ;;  %v1035_v34 = vadd.f32 %v967_v39, %v966_v26  ;;  %vm848_vm2 = vcmp.eq.s32.totalorder %v2432_v56, %v2583_v19  ;;  %vm849_vm3 = vcmp.eq.s32.totalorder %v2435_v61, %v2583_v19  ;;  %686 = vadd.xlane.f32.xlu0 %v685_v43  ;;  %v2764_v19 = vpop.permute.xlu0 %810 }
 0x114   : > { %v928_v60 = vsel %vm2696_vm12, %v1695_v62, 0  ;;  %1630 = vpow2.f32 %v2615_v9  ;;  %v1032_v23 = vadd.f32 %v1031_v17, %v965_v40  ;;  %v3326_v11 = vsub.f32 %v2128_v8, %v2269_v7  ;;  %v1696_v9 = vld [vmem:[%s1935_s28 + $0x90] sm:$0xff]  ;;  %vm2750_vm9 = vmpackc.low %vm849_vm3, %vm848_vm2  ;;  %v1699_v17 = vld [vmem:[%s1935_s28 + $0x98] sm:$0xff] }
 0x115   : > { %v1042_v24 = vadd.f32 %v1041_v50, %v973_v52  ;;  %1632 = vpow2.f32 %v2620_v33  ;;  %v1629_v47 = vpop.eup %1628  ;;  %vm858_vm5 = vcmp.eq.s32.totalorder %v2408_v16, %v2681_v54  ;;  %vm856_vm6 = vcmp.eq.s32.totalorder %v2432_v56, %v799_v3  ;;  %v2816_v52 = vpop.permute.xlu2 %813  ;;  %v3338_v62 = vld [vmem:[#allocation60_spill] sm:$0xff] }
 0x116   : > { %v619_v13 = vmul.f32 1.442695, %v3326_v11  ;;  %vm857_vm7 = vcmp.eq.s32.totalorder %v2435_v61, %v799_v3  ;;  %v932_v33 = vsel %vm2709_vm1, %v1696_v9, 0  ;;  %vm859_vm8 = vcmp.eq.s32.totalorder %v2429_v63, %v2681_v54  ;;  %1033 = vadd.xlane.f32.xlu1 %v1032_v23  ;;  %v1701_v9 = vld [vmem:[%s1935_s28 + $0x88] sm:$0xff] }
 0x117   : > { %1043 = vadd.xlane.f32.xlu2 %v1042_v24  ;;  %v1036_v1 = vadd.f32 %v1035_v34, %v968_v0  ;;  %v974_v28 = vunpack.c.l.bf16 %v928_v60  ;;  %v975_v4 = vunpack.c.h.bf16 %v928_v60  ;;  %vm852_vm10 = vcmp.eq.s32.totalorder %v2432_v56, %v2622_v32  ;;  %vm2771_vm12 = vmpackc.low %vm857_vm7, %vm856_vm6  ;;  %v3337_v34 = vld [vmem:[#allocation59_spill] sm:$0xff] }
 0x118   : > { %v699_v21 = vadd.f32 %v2553_v42, %v2654_v37  ;;  %1634 = vpow2.f32 %v627_v6  ;;  %v2760_v48 = vadd.f32 %v2656_v30, %v2599_v36  ;;  %vm853_vm11 = vcmp.eq.s32.totalorder %v2435_v61, %v2622_v32  ;;  %v1697_v36 = vld [vmem:[%s1935_s28 + $0x80] sm:$0xff]  ;;  %vm2784_vm13 = vmpackc.low %vm859_vm8, %vm858_vm5 }
 0x119   : > { %v969_v20 = vunpack.c.h.bf16 %v2677_v18  ;;  %v982_v42 = vunpack.c.l.bf16 %v932_v33  ;;  %v983_v37 = vunpack.c.h.bf16 %v932_v33  ;;  %v930_v30 = vsel %vm2731_vm4, %v1697_v36, 0  ;;  %vm2809_vm2 = vmpackc.low %vm853_vm11, %vm852_vm10 }
 0x11a   : > { %v1631_v26 = vpop.eup %1630  ;;  %v695_v39 = vadd.f32 %v1629_v47, %v694_v22  ;;  %v929_v6 = vsel %vm2750_vm9, %v1698_v10, 0  ;;  %1636 = vpow2.f32 %v619_v13  ;;  %vm862_vm14 = vcmp.eq.s32.totalorder %v2408_v16, %v2707_v31 }
 0x11b   : > { %v1633_v25 = vpop.eup %1632  ;;  %vm863_vm15 = vcmp.eq.s32.totalorder %v2429_v63, %v2707_v31  ;;  %v1037_v43 = vadd.f32 %v1036_v1, %v969_v20  ;;  %v1045_v3 = vadd.f32 %v975_v4, %v974_v28  ;;  %vm870_vm0 = vcmp.eq.s32.totalorder %v2408_v16, %v2764_v19 }
 0x11c   : > { %vm871_vm1 = vcmp.eq.s32.totalorder %v2429_v63, %v2764_v19  ;;  %v705_v22 = vadd.f32 %v1631_v26, %v2685_v46  ;;  %v933_v57 = vsel %vm2771_vm12, %v1699_v17, 0  ;;  %v934_v40 = vsel %vm2784_vm13, %v1700_v51, 0  ;;  %vm2832_vm5 = vmpackc.low %vm863_vm15, %vm862_vm14  ;;  %v1703_v26 = vld [vmem:[%s1935_s28 + $0xd0] sm:$0xff]  ;;  %v1706_v51 = vld [vmem:[%s1935_s28 + $0xe0] sm:$0xff] }
 0x11d   : > { %1038 = vadd.xlane.f32.xlu0 %v1037_v43  ;;  %v1055_v46 = vadd.f32 %v983_v37, %v982_v42  ;;  %v976_v50 = vunpack.c.l.bf16 %v929_v6  ;;  %v708_v60 = vadd.f32 %v3338_v62, %v3337_v34  ;;  %vm860_vm3 = vcmp.eq.s32.totalorder %v2432_v56, %v2681_v54  ;;  %vm2842_vm6 = vmpackc.low %vm871_vm1, %vm870_vm0  ;;  %v1702_v42 = vld [vmem:[%s1935_s28 + $0xb0] sm:$0xff] }
 0x11e   : > { %v2820_v23 = vpop.eup %1634  ;;  %vm861_vm4 = vcmp.eq.s32.totalorder %v2435_v61, %v2681_v54  ;;  %v700_v24 = vadd.f32 %v1633_v25, %v699_v21  ;;  %v978_v11 = vunpack.c.l.bf16 %v930_v30  ;;  %696 = vadd.xlane.f32.xlu1 %v695_v39  ;;  %v984_v47 = vunpack.c.l.bf16 %v933_v57  ;;  %v2861_v21 = vpop.permute.xlu1 %807 }
 0x11f   : > { %706 = vadd.xlane.f32.xlu2 %v705_v22  ;;  %v1046_v41 = vadd.f32 %v1045_v3, %v976_v50  ;;  %v2849_v33 = vsel %vm2809_vm2, %v1701_v9, 0  ;;  %v979_v1 = vunpack.c.h.bf16 %v930_v30  ;;  %vm874_vm7 = vcmp.eq.s32.totalorder %v2408_v16, %v2816_v52  ;;  %vm903_vm11 = vmpackc.low %vm861_vm4, %vm860_vm3  ;;  %v1705_v22 = vld [vmem:[%s1935_s28 + $0xd8] sm:$0xff] }
 0x120   : > { %v2851_v49 = vpop.eup %1636  ;;  %vm875_vm8 = vcmp.eq.s32.totalorder %v2429_v63, %v2816_v52  ;;  %v986_v28 = vunpack.c.l.bf16 %v934_v40  ;;  %v987_v4 = vunpack.c.h.bf16 %v934_v40  ;;  %vm872_vm9 = vcmp.eq.s32.totalorder %v2432_v56, %v2764_v19 }
 0x121   : > { %vm873_vm10 = vcmp.eq.s32.totalorder %v2435_v61, %v2764_v19  ;;  %v1056_v20 = vadd.f32 %v1055_v46, %v984_v47  ;;  %v977_v5 = vunpack.c.h.bf16 %v929_v6  ;;  %v2872_v37 = vsel %vm2832_vm5, %v1702_v42, 0  ;;  %vm2887_vm14 = vmpackc.low %vm875_vm8, %vm874_vm7  ;;  %v1704_v6 = vld [vmem:[%s1935_s28 + $0xa8] sm:$0xff] }
 0x122   : > { %v940_v36 = vsel %vm2842_vm6, %v1703_v26, 0  ;;  %vm876_vm12 = vcmp.eq.s32.totalorder %v2432_v56, %v2816_v52  ;;  %vm877_vm13 = vcmp.eq.s32.totalorder %v2435_v61, %v2816_v52  ;;  %v985_v30 = vunpack.c.h.bf16 %v933_v57  ;;  %vm909_vm1 = vmpackc.low %vm873_vm10, %vm872_vm9  ;;  %v3345_v46 = vld [vmem:[#allocation11_spill] sm:$0xff] }
 0x123   : > { %v1047_v18 = vadd.f32 %v1046_v41, %v977_v5  ;;  %v980_v39 = vunpack.c.l.bf16 %v2849_v33  ;;  %v1050_v10 = vadd.f32 %v979_v1, %v978_v11  ;;  %vm866_vm15 = vcmp.eq.s32.totalorder %v2408_v16, %v2861_v21  ;;  %vm911_vm6 = vmpackc.low %vm877_vm13, %vm876_vm12  ;;  %v1707_v52 = vld [vmem:[%s1935_s28 + $0xe8] sm:$0xff]  ;;  %v1708_v5 = vld [vmem:[%s1935_s28 + $0xc0] sm:$0xff] }
 0x124   : > { %vm867_vm0 = vcmp.eq.s32.totalorder %v2429_v63, %v2861_v21  ;;  %v935_v25 = vsel %vm903_vm11, %v1704_v6, 0  ;;  %v1060_v43 = vadd.f32 %v987_v4, %v986_v28  ;;  %v1057_v3 = vadd.f32 %v1056_v20, %v985_v30  ;;  %v3350_v26 = vld [vmem:[#allocation15_spill] sm:$0xff]  ;;  %v3352_v30 = vld [vmem:[#allocation54_spill] sm:$0xff]  ;;  %v1709_v6 = vld [vmem:[%s1935_s28 + $0xb8] sm:$0xff] }
 0x125   : > { %701 = vadd.xlane.f32.xlu0 %v700_v24  ;;  %v941_v17 = vsel %vm909_vm1, %v1705_v22, 0  ;;  %v998_v57 = vunpack.c.l.bf16 %v940_v36  ;;  %v999_v0 = vunpack.c.h.bf16 %v940_v36  ;;  %vm864_vm2 = vcmp.eq.s32.totalorder %v2432_v56, %v2707_v31  ;;  %vm2918_vm4 = vmpackc.low %vm867_vm0, %vm866_vm15 }
 0x126   : > { %vm865_vm3 = vcmp.eq.s32.totalorder %v2435_v61, %v2707_v31  ;;  %v942_v40 = vsel %vm2887_vm14, %v1706_v51, 0  ;;  %v709_v50 = vadd.f32 %v3345_v46, %v708_v60  ;;  %1048 = vadd.xlane.f32.xlu1 %v1047_v18  ;;  %v1051_v34 = vadd.f32 %v1050_v10, %v980_v39  ;;  %v3351_v31 = vld [vmem:[#allocation16_spill] sm:$0xff] }
 0x127   : > { %1058 = vadd.xlane.f32.xlu2 %v1057_v3  ;;  %v988_v62 = vunpack.c.l.bf16 %v935_v25  ;;  %v1000_v32 = vunpack.c.l.bf16 %v941_v17  ;;  %v1075_v24 = vadd.f32 %v999_v0, %v998_v57  ;;  %vm868_vm5 = vcmp.eq.s32.totalorder %v2432_v56, %v2861_v21  ;;  %vm2941_vm8 = vmpackc.low %vm865_vm3, %vm864_vm2  ;;  %v3353_v18 = vld [vmem:[#allocation40_spill] sm:$0xff] }
 0x128   : > { %v981_v60 = vunpack.c.h.bf16 %v2849_v33  ;;  %v990_v11 = vunpack.c.l.bf16 %v2872_v37  ;;  %v991_v13 = vunpack.c.h.bf16 %v2872_v37  ;;  %vm869_vm7 = vcmp.eq.s32.totalorder %v2435_v61, %v2861_v21  ;;  %v3355_v21 = vld [vmem:[#allocation17_spill] sm:$0xff] }
 0x129   : > { %v1061_v47 = vadd.f32 %v1060_v43, %v988_v62  ;;  %v1001_v9 = vunpack.c.h.bf16 %v941_v17  ;;  %v1076_v33 = vadd.f32 %v1075_v24, %v1000_v32  ;;  %v989_v1 = vunpack.c.h.bf16 %v935_v25  ;;  %vm907_vm9 = vmpackc.low %vm869_vm7, %vm868_vm5  ;;  %v1710_v17 = vld [vmem:[%s1935_s28 + $0xc8] sm:$0xff] }
 0x12a   : > { %v943_v28 = vsel %vm911_vm6, %v1707_v52, 0  ;;  %v1002_v4 = vunpack.c.l.bf16 %v942_v40  ;;  %v1003_v20 = vunpack.c.h.bf16 %v942_v40  ;;  %v938_v42 = vsel %vm2918_vm4, %v1708_v5, 0  ;;  %v817_v40 = vpop.permute.xlu1 %816  ;;  %v3361_v52 = vld [vmem:[#allocation34_spill] sm:$0xff] }
 0x12b   : > { %v1052_v37 = vadd.f32 %v1051_v34, %v981_v60  ;;  %v421_v36 = vadd.f32 %v3351_v31, %v3350_v26  ;;  %v2951_v54 = vadd.f32 %v1076_v33, %v1001_v9  ;;  %v521_v39 = vsub.f32 %v3353_v18, %v3352_v30  ;;  %v3356_v60 = vld [vmem:[#allocation12_spill] sm:$0xff] }
 0x12c   : > { %v710_v10 = vadd.f32 %v2851_v49, %v709_v50  ;;  %v937_v25 = vsel %vm2941_vm8, %v1709_v6, 0  ;;  %v1080_v43 = vadd.f32 %v1003_v20, %v1002_v4  ;;  %v1062_v3 = vadd.f32 %v1061_v47, %v989_v1  ;;  %v3354_v49 = vld [vmem:[#allocation41_spill] sm:$0xff]  ;;  %v3360_v1 = vld [vmem:[#allocation62_spill] sm:$0xff] }
 0x12d   : > { %1053 = vadd.xlane.f32.xlu0 %v1052_v37  ;;  %v1065_v22 = vadd.f32 %v991_v13, %v990_v11  ;;  %v939_v57 = vsel %vm907_vm9, %v1710_v17, 0  ;;  %v1004_v0 = vunpack.c.l.bf16 %v943_v28  ;;  %v522_v51 = vsub.f32 %v3354_v49, %v3352_v30  ;;  %v3357_v11 = vld [vmem:[#allocation38_spill] sm:$0xff]  ;;  %v3358_v13 = vld [vmem:[#allocation52_spill] sm:$0xff] }
 0x12e   : > { %v714_v46 = vadd.f32 %v2679_v2, %v2760_v48  ;;  %v994_v50 = vunpack.c.l.bf16 %v938_v42  ;;  %v995_v19 = vunpack.c.h.bf16 %v938_v42  ;;  %711 = vadd.xlane.f32.xlu1 %v710_v10  ;;  %v422_v34 = vadd.f32 %v421_v36, %v3355_v21 }
 0x12f   : > { %1063 = vadd.xlane.f32.xlu2 %v1062_v3  ;;  %v992_v62 = vunpack.c.l.bf16 %v937_v25  ;;  %v1005_v32 = vunpack.c.h.bf16 %v943_v28  ;;  %v1081_v24 = vadd.f32 %v1080_v43, %v1004_v0  ;;  %1638 = vpow2.f32 %v3356_v60  ;;  %v3362_v28 = vld [vmem:[#allocation50_spill] sm:$0xff]  ;;  %v3365_v43 = vld [vmem:[#allocation37_spill] sm:$0xff] }
 0x130   : > { %v3359_v47 = vsub.f32 %v3357_v11, %v3358_v13  ;;  %v996_v9 = vunpack.c.l.bf16 %v939_v57  ;;  %v1070_v33 = vadd.f32 %v995_v19, %v994_v50  ;;  %vm878_vm10 = vcmp.eq.s32.totalorder %v2408_v16, %v817_v40  ;;  %v3368_v0 = vld [vmem:[#allocation22_spill] sm:$0xff]  ;;  %v1712_v50 = vld [vmem:[%s1935_s28 + $0xf8] sm:$0xff] }
 0x131   : > { %vm879_vm11 = vcmp.eq.s32.totalorder %v2429_v63, %v817_v40  ;;  %v1066_v2 = vadd.f32 %v1065_v22, %v992_v62  ;;  %v2977_v48 = vadd.f32 %v1081_v24, %v1005_v32  ;;  %1640 = vpow2.f32 %v3360_v1  ;;  %v3370_v60 = vld [vmem:[#allocation26_spill] sm:$0xff] }
 0x132   : > { %v635_v41 = vmul.f32 1.442695, %v3359_v47  ;;  %v3363_v4 = vsub.f32 %v3361_v52, %v3362_v28  ;;  %v997_v5 = vunpack.c.h.bf16 %v939_v57  ;;  %v1071_v42 = vadd.f32 %v1070_v33, %v996_v9  ;;  %vm912_vm12 = vmpackc.low %vm879_vm11, %vm878_vm10 }
 0x133   : > { %v715_v37 = vadd.f32 %v2820_v23, %v714_v46  ;;  %v423_v26 = vadd.f32 %v422_v34, %v2086_v35  ;;  %v993_v31 = vunpack.c.h.bf16 %v937_v25  ;;  %v718_v16 = vadd.f32 %v2592_v38, %v2585_v15  ;;  %v3364_v35 = vld [vmem:[#allocation42_spill] sm:$0xff] }
 0x134   : > { %v641_v20 = vmul.f32 1.442695, %v3363_v4  ;;  %v645_v63 = vmul.f32 1.442695, %v521_v39  ;;  %1642 = vpow2.f32 %v635_v41  ;;  %v1072_v36 = vadd.f32 %v1071_v42, %v997_v5  ;;  %v1711_v39 = vld [vmem:[%s1935_s28 + $0xf0] sm:$0xff]  ;;  %v3372_v41 = vld [vmem:[#allocation21_spill] sm:$0xff] }
 0x135   : > { %v647_v10 = vmul.f32 1.442695, %v522_v51  ;;  %vm880_vm13 = vcmp.eq.s32.totalorder %v2432_v56, %v817_v40  ;;  %vm881_vm14 = vcmp.eq.s32.totalorder %v2435_v61, %v817_v40  ;;  %716 = vadd.xlane.f32.xlu0 %v715_v37  ;;  %v1067_v6 = vadd.f32 %v1066_v2, %v993_v31  ;;  %v1639_v23 = vpop.eup %1638  ;;  %v3367_v61 = vld [vmem:[#allocation43_spill] sm:$0xff]  ;;  %v3371_v40 = vld [vmem:[#allocation20_spill] sm:$0xff] }
 0x136   : > { %1644 = vpow2.f32 %v641_v20  ;;  %v523_v25 = vsub.f32 %v3364_v35, %v3352_v30  ;;  %v3366_v15 = vsub.f32 %v3365_v43, %v3362_v28  ;;  %v944_v3 = vsel %vm912_vm12, %v1711_v39, 0  ;;  %424 = vadd.xlane.f32.xlu1 %v423_v26  ;;  %vm913_vm15 = vmpackc.low %vm881_vm14, %vm880_vm13  ;;  %v3369_v51 = vld [vmem:[#allocation23_spill] sm:$0xff] }
 0x137   : > { %1068 = vadd.xlane.f32.xlu2 %v1067_v6  ;;  %v719_v22 = vadd.f32 %v1639_v23, %v718_v16  ;;  %v1641_v17 = vpop.eup %1640  ;;  %1646 = vpow2.f32 %v645_v63  ;;  %v524_v57 = vsub.f32 %v3367_v61, %v3352_v30  ;;  %v426_v46 = vadd.f32 %v3369_v51, %v3368_v0  ;;  %v3373_v16 = vld [vmem:[#allocation25_spill] sm:$0xff]  ;;  %v3375_v39 = vld [vmem:[#allocation19_spill] sm:$0xff]  ;;  %v3378_v0 = vld [vmem:[#allocation24_spill] sm:$0xff] }
 0x138   : > { %v643_v38 = vmul.f32 1.442695, %v3366_v15  ;;  %1648 = vpow2.f32 %v647_v10  ;;  %v945_v19 = vsel %vm913_vm15, %v1712_v50, 0  ;;  %v649_v34 = vmul.f32 1.442695, %v523_v25 }
 0x139   : > { %v1006_v62 = vunpack.c.l.bf16 %v944_v3  ;;  %v1007_v32 = vunpack.c.h.bf16 %v944_v3  ;;  %v427_v47 = vadd.f32 %v426_v46, %v3370_v60  ;;  %v723_v56 = vadd.f32 %v1641_v17, %v2563_v59  ;;  %v3379_v46 = vld [vmem:[#allocation35_spill] sm:$0xff] }
 0x13a   : > { %v1643_v21 = vpop.eup %1642  ;;  %1650 = vpow2.f32 %v643_v38  ;;  %v431_v9 = vadd.f32 %v3372_v41, %v3371_v40  ;;  %v1008_v2 = vunpack.c.l.bf16 %v945_v19  ;;  %v651_v5 = vmul.f32 1.442695, %v524_v57  ;;  %v3374_v38 = vld [vmem:[#allocation18_spill] sm:$0xff]  ;;  %v3384_v40 = vld [vmem:[#allocation28_spill] sm:$0xff] }
 0x13b   : > { %v720_v24 = vadd.f32 %v1643_v21, %v719_v22  ;;  %v1085_v1 = vadd.f32 %v1007_v32, %v1006_v62  ;;  %v428_v4 = vadd.f32 %v427_v47, %v3278_v44  ;;  %1652 = vpow2.f32 %v649_v34  ;;  %v3377_v22 = vld [vmem:[#allocation30_spill] sm:$0xff]  ;;  %v3382_v32 = vld [vmem:[#allocation36_spill] sm:$0xff] }
 0x13c   : > { %v1645_v33 = vpop.eup %1644  ;;  %v1009_v42 = vunpack.c.h.bf16 %v945_v19  ;;  %v432_v59 = vadd.f32 %v431_v9, %v3373_v16  ;;  %1654 = vpow2.f32 %v651_v5  ;;  %v436_v3 = vadd.f32 %v3375_v39, %v3374_v38  ;;  %v3380_v19 = vld [vmem:[#allocation32_spill] sm:$0xff] }
 0x13d   : > { %721 = vadd.xlane.f32.xlu0 %v720_v24  ;;  %v1647_v20 = vpop.eup %1646  ;;  %v1086_v37 = vadd.f32 %v1085_v1, %v1008_v2  ;;  %v724_v31 = vadd.f32 %v1645_v33, %v723_v56  ;;  %v456_v47 = vadd.f32 %v3354_v49, %v3353_v18  ;;  %v3383_v56 = vld [vmem:[#allocation27_spill] sm:$0xff]  ;;  %v657_v18 = vpop.xlane.xlu0 %656  ;;  %vm1298_vm4 = vcmask 7168  }
 0x13e   : > { %v1649_v26 = vpop.eup %1648  ;;  %429 = vadd.xlane.f32.xlu1 %v428_v4  ;;  %v433_v23 = vadd.f32 %v432_v59, %v2135_v53  ;;  %v437_v51 = vadd.f32 %v436_v3, %v3378_v0  ;;  %v3381_v53 = vld [vmem:[#allocation33_spill] sm:$0xff]  ;;  %v451_v41 = vadd.f32 %v3384_v40, %v3383_v56  ;;  %v1715_v40 = vld [vmem:[%s2229_s4 + $0x8] sm:$0xff] }
 0x13f   : > { %1073 = vadd.xlane.f32.xlu2 %v1072_v36  ;;  %v1087_v10 = vadd.f32 %v1086_v37, %v1009_v42  ;;  %v728_v25 = vadd.f32 %v1649_v26, %v1647_v20  ;;  %v3376_v36 = vld [vmem:[#allocation29_spill] sm:$0xff]  ;;  %v441_v21 = vadd.f32 %v3381_v53, %v3380_v19  ;;  %v3386_v26 = vld [vmem:[#allocation58_spill] sm:$0xff]  ;;  %vm1235_vm2 = vcmp.ne.s32.totalorder %v1715_v40, 0 }
 0x140   : > { %v1651_v63 = vpop.eup %1650  ;;  %v446_v17 = vadd.f32 %v3377_v22, %v3376_v36  ;;  %v438_v62 = vadd.f32 %v437_v51, %v2128_v8  ;;  %v457_v8 = vadd.f32 %v456_v47, %v3364_v35  ;;  %v1713_v59 = vld [vmem:[%s2229_s4 + $0x18] sm:$0xff]  ;;  %v3388_v51 = vld [vmem:[#allocation55_spill] sm:$0xff] }
 0x141   : > { %v725_v6 = vadd.f32 %v1651_v63, %v724_v31  ;;  %v1653_v15 = vpop.eup %1652  ;;  %v442_v24 = vadd.f32 %v441_v21, %v3382_v32  ;;  %v1125_v31 = vmul.f32 0.00019607843, %v3386_v26  ;;  %vm1237_vm0 = vcmp.ne.s32.totalorder %v1713_v59, 0  ;;  %v1716_v26 = vld [vmem:[%s2229_s4 + $0x10] sm:$0xff] }
 0x142   : > { %v729_v44 = vadd.f32 %v1653_v15, %v728_v25  ;;  %v1655_v57 = vpop.eup %1654  ;;  %v447_v50 = vadd.f32 %v446_v17, %v3379_v46  ;;  %v458_v33 = vadd.f32 %v457_v8, %v3367_v61  ;;  %v3385_v61 = vld [vmem:[#allocation48_spill] sm:$0xff]  ;;  %v3387_v15 = vld [vmem:[#allocation45_spill] sm:$0xff]  ;;  %v1714_v17 = vld [vmem:[%s2229_s4] sm:$0xff]  ;;  %v1122_v46 = vmul.f32 0.00019607843, %v3388_v51 }
 0x143   : > { %v443_v60 = vadd.f32 %v442_v24, %v3299_v45  ;;  %vm1234_vm1 = vcmp.ne.s32.totalorder %v1714_v17, 0  ;;  %vm1236_vm3 = vcmp.ne.s32.totalorder %v1716_v26, 0 }
 0x144   : > { %v730_v34 = vadd.f32 %v1655_v57, %v729_v44  ;;  %v1830_v57 = vmov 0.0  }
 0x145   : > { %726 = vadd.xlane.f32.xlu0 %v725_v6  ;;  %v1454_v0 = vsel %vm1237_vm0, 1.0, %v1830_v57 }
 0x146   : > { %434 = vadd.xlane.f32.xlu1 %v433_v23 }
 0x147   : > { %1078 = vadd.xlane.f32.xlu2 %v2951_v54  ;;  %v448_v54 = vadd.f32 %v447_v50, %v3357_v11  ;;  %v452_v11 = vadd.f32 %v451_v41, %v3361_v52  ;;  %v3389_v50 = vld [vmem:[#allocation47_spill] sm:$0xff] }
 0x149   : > { %v453_v2 = vadd.f32 %v452_v11, %v3365_v43 }
 0x14d   : > { %731 = vadd.xlane.f32.xlu0 %v730_v34 }
 0x14e   : > { %439 = vadd.xlane.f32.xlu1 %v438_v62  ;;  %v3390_v62 = vld [vmem:[#allocation51_spill] sm:$0xff] }
 0x14f   : > { %449 = vadd.xlane.f32.xlu2 %v448_v54  ;;  %v1123_v54 = vmul.f32 0.00019607843, %v3390_v62 }
 0x155   : > { %444 = vadd.xlane.f32.xlu0 %v443_v60 }
 0x156   : > { %1083 = vadd.xlane.f32.xlu1 %v2977_v48 }
 0x157   : > { %v662_v9 = vpop.xlane.xlu2 %661  ;;  %459 = vadd.xlane.f32.xlu2 %v458_v33 }
 0x158   : > { %v667_v35 = vpop.xlane.xlu1 %666 }
 0x15d   : > { %1088 = vadd.xlane.f32.xlu0 %v1087_v10 }
 0x15e   : > { %454 = vadd.xlane.f32.xlu1 %v453_v2  ;;  %v1451_v2 = vsel %vm1234_vm1, 1.0, %v1830_v57 }
 0x15f   : > { %v672_v45 = vpop.xlane.xlu2 %671 }
 0x160   : > { %1656 = vlog2.f32 %v672_v45 }
 0x161   : > { %1658 = vlog2.f32 %v657_v18 }
 0x162   : > { %1660 = vlog2.f32 %v662_v9 }
 0x163   : > { %1662 = vlog2.f32 %v667_v35 }
 0x166   : > { %v1657_v1 = vpop.eup %1656 }
 0x167   : > { %v677_v49 = vpop.xlane.xlu2 %676  ;;  %v740_v48 = vmul.f32 0.6931472, %v1657_v1  ;;  %v1659_v52 = vpop.eup %1658  ;;  %v3391_v1 = vld [vmem:[#allocation46_spill] sm:$0xff] }
 0x168   : > { %v1661_v42 = vpop.eup %1660  ;;  %v734_v37 = vmul.f32 0.6931472, %v1659_v52  ;;  %1664 = vlog2.f32 %v677_v49  ;;  %v1452_v52 = vsel %vm1235_vm2, 1.0, %v1830_v57 }
 0x169   : > { %v1173_v5 = vadd.f32 %v740_v48, %v3385_v61  ;;  %v736_v10 = vmul.f32 0.6931472, %v1661_v42  ;;  %v1663_v39 = vpop.eup %1662 }
 0x16a   : > { %v1170_v44 = vadd.f32 %v734_v37, %v3387_v15  ;;  %v738_v24 = vmul.f32 0.6931472, %v1663_v39  ;;  %v1453_v15 = vsel %vm1236_vm3, 1.0, %v1830_v57 }
 0x16b   : > { %v1189_v6 = vmul.f32 1.0001961, %v1173_v5  ;;  %v1171_v19 = vadd.f32 %v736_v10, %v3389_v50 }
 0x16c   : > { %v1186_v32 = vmul.f32 1.0001961, %v1170_v44  ;;  %v1172_v48 = vadd.f32 %v738_v24, %v3391_v1 }
 0x16d   : > { %v1187_v8 = vmul.f32 1.0001961, %v1171_v19 }
 0x16e   : > { %v1665_v5 = vpop.eup %1664 }
 0x170   : > { %v1029_v4 = vpop.xlane.xlu2 %1028 }
 0x171   : > { %v1093_v20 = vpack.c.bf16 %v1029_v4, %v1029_v4 }
 0x173   : > { %v1109_v43 = vunpack.c.l.bf16 %v1093_v20  ;;  %v3392_v20 = vld [vmem:[#allocation57_spill] sm:$0xff] }
 0x174   : > { %v1124_v61 = vmul.f32 0.00019607843, %v3392_v20 }
 0x175   : > { %v1141_v16 = vmul.f32 0.89980394, %v1109_v43 }
 0x176   : > { %v1014_v63 = vpop.xlane.xlu0 %1013 }
 0x177   : > { %v1157_v23 = vadd.f32 %v1141_v16, %v1125_v31  ;;  %v1090_v25 = vpack.c.bf16 %v1014_v63, %v1014_v63  ;;  %v1188_v31 = vmul.f32 1.0001961, %v1172_v48  ;;  %v742_v63 = vmul.f32 0.6931472, %v1665_v5 }
 0x179   : > { %v1019_v38 = vpop.xlane.xlu1 %1018  ;;  %v1205_v3 = vsub.f32 %v1157_v23, %v1189_v6  ;;  %v1106_v36 = vunpack.c.l.bf16 %v1090_v25  ;;  %v692_v45 = vpop.xlane.xlu2 %691 }
 0x17a   : > { %v1091_v22 = vpack.c.bf16 %v1019_v38, %v1019_v38 }
 0x17b   : > { %v1221_v53 = vsub.f32 0.0, %v1205_v3  ;;  %v1138_v21 = vmul.f32 0.89980394, %v1106_v36 }
 0x17c   : > { %v1107_v34 = vunpack.c.l.bf16 %v1091_v22 }
 0x17d   : > { %v1285_v60 = vmul.f32 %v1454_v0, %v1221_v53  ;;  %v1154_v47 = vadd.f32 %v1138_v21, %v1122_v46  ;;  %v3393_v0 = vld [vmem:[#allocation44_spill] sm:$0xff]  ;;  %v3394_v53 = vld [vmem:[#allocation53_spill] sm:$0xff] }
 0x17e   : > { %v1139_v56 = vmul.f32 0.89980394, %v1107_v34  ;;  %v1024_v41 = vpop.xlane.xlu0 %1023  ;;  %v1174_v51 = vadd.f32 %v742_v63, %v3393_v0  ;;  %v1126_v21 = vmul.f32 0.00019607843, %v3394_v53 }
 0x17f   : > { %v1202_v11 = vsub.f32 %v1154_v47, %v1186_v32  ;;  %v1092_v33 = vpack.c.bf16 %v1024_v41, %v1024_v41 }
 0x180   : > { %v1155_v9 = vadd.f32 %v1139_v56, %v1123_v54  ;;  %v1717_v54 = vld [vmem:[%s2229_s4 + $0x20] sm:$0xff]  ;;  %v3395_v56 = vld [vmem:[#allocation61_spill] sm:$0xff]  ;;  %v1190_v41 = vmul.f32 1.0001961, %v1174_v51 }
 0x181   : > { %v682_v18 = vpop.xlane.xlu1 %681  ;;  %v1218_v35 = vsub.f32 0.0, %v1202_v11  ;;  %v1108_v4 = vunpack.c.l.bf16 %v1092_v33  ;;  %vm1238_vm5 = vcmp.ne.s32.totalorder %v1717_v54, 0  ;;  %v1128_v40 = vmul.f32 0.00019607843, %v3395_v56  ;;  %v1720_v56 = vld [vmem:[%s2229_s4 + $0x38] sm:$0xff] }
 0x182   : > { %v1203_v49 = vsub.f32 %v1155_v9, %v1187_v8  ;;  %1666 = vlog2.f32 %v682_v18  ;;  %v1304_v33 = vsel %vm1298_vm4, %v1285_v60, 0.0  ;;  %v1455_v5 = vsel %vm1238_vm5, 1.0, %v1830_v57 }
 0x183   : > { %v1282_v43 = vmul.f32 %v1451_v2, %v1218_v35  ;;  %v1140_v37 = vmul.f32 0.89980394, %v1108_v4  ;;  %vm1241_vm8 = vcmp.ne.s32.totalorder %v1720_v56, 0 }
 0x184   : > { %v1219_v42 = vsub.f32 0.0, %v1203_v49 }
 0x185   : > { %v1156_v59 = vadd.f32 %v1140_v37, %v1124_v61  ;;  %v1299_v6 = vsel %vm1298_vm4, %v1282_v43, 0.0  ;;  %v1718_v43 = vld [vmem:[%s2229_s4 + $0x30] sm:$0xff] }
 0x186   : > { %v1283_v16 = vmul.f32 %v1452_v52, %v1219_v42  ;;  %v687_v10 = vpop.xlane.xlu0 %686  ;;  %vm1240_vm6 = vcmp.ne.s32.totalorder %v1718_v43, 0 }
 0x187   : > { %v1204_v25 = vsub.f32 %v1156_v59, %v1188_v31  ;;  %1668 = vlog2.f32 %v687_v10  ;;  %v1457_v59 = vsel %vm1240_vm6, 1.0, %v1830_v57 }
 0x188   : > { %v1300_v23 = vsel %vm1298_vm4, %v1283_v16, 0.0  ;;  %v1667_v3 = vpop.eup %1666  ;;  %1670 = vlog2.f32 %v692_v45  ;;  %v3396_v45 = vld [vmem:[#allocation31_spill] sm:$0xff] }
 0x189   : > { %v1301_v44 = vadd.f32 %v1300_v23, %v1299_v6  ;;  %v1034_v38 = vpop.xlane.xlu1 %1033  ;;  %v1220_v36 = vsub.f32 0.0, %v1204_v25  ;;  %v744_v34 = vmul.f32 0.6931472, %v1667_v3  ;;  %v1127_v42 = vmul.f32 0.00019607843, %v3396_v45 }
 0x18a   : > { %v1044_v39 = vpop.xlane.xlu2 %1043  ;;  %v1094_v22 = vpack.c.bf16 %v1034_v38, %v1034_v38 }
 0x18b   : > { %v1096_v17 = vpack.c.bf16 %v1044_v39, %v1044_v39  ;;  %v1284_v46 = vmul.f32 %v1453_v15, %v1220_v36  ;;  %v1175_v52 = vadd.f32 %v744_v34, %v2253_v58 }
 0x18c   : > { %v1110_v50 = vunpack.c.l.bf16 %v1094_v22 }
 0x18d   : > { %v1112_v19 = vunpack.c.l.bf16 %v1096_v17  ;;  %v1669_v62 = vpop.eup %1668  ;;  %v1302_v32 = vsel %vm1298_vm4, %v1284_v46, 0.0  ;;  %v1191_v63 = vmul.f32 1.0001961, %v1175_v52 }
 0x18e   : > { %v1142_v24 = vmul.f32 0.89980394, %v1110_v50  ;;  %v1303_v8 = vadd.f32 %v1302_v32, %v1301_v44  ;;  %v746_v11 = vmul.f32 0.6931472, %v1669_v62  ;;  %v1671_v16 = vpop.eup %1670  ;;  %v3397_v50 = vld [vmem:[#allocation49_spill] sm:$0xff] }
 0x18f   : > { %v1144_v47 = vmul.f32 0.89980394, %v1112_v19  ;;  %v748_v38 = vmul.f32 0.6931472, %v1671_v16 }
 0x190   : > { %v1039_v9 = vpop.xlane.xlu0 %1038  ;;  %v1158_v2 = vadd.f32 %v1142_v24, %v1126_v21  ;;  %v1176_v1 = vadd.f32 %v746_v11, %v2261_v55  ;;  %v1305_v48 = vadd.f32 %v1304_v33, %v1303_v8  ;;  %v1719_v55 = vld [vmem:[%s2229_s4 + $0x28] sm:$0xff]  ;;  %v3398_v21 = vld [vmem:[#allocation56_spill] sm:$0xff] }
 0x191   : > { %v1095_v18 = vpack.c.bf16 %v1039_v9, %v1039_v9  ;;  %v1160_v35 = vadd.f32 %v1144_v47, %v1128_v40  ;;  %v697_v49 = vpop.xlane.xlu1 %696  ;;  %vm1239_vm7 = vcmp.ne.s32.totalorder %v1719_v55, 0  ;;  %v1177_v19 = vadd.f32 %v748_v38, %v3397_v50  ;;  %v1721_v55 = vld [vmem:[%s2229_s4 + $0x40] sm:$0xff] }
 0x192   : > { %v3057_v4 = vpop.xlane.xlu2 %706  ;;  %v1206_v20 = vsub.f32 %v1158_v2, %v1190_v41  ;;  %v1192_v60 = vmul.f32 1.0001961, %v1176_v1  ;;  %v1456_v44 = vsel %vm1239_vm7, 1.0, %v1830_v57  ;;  %1672 = vlog2.f32 %v697_v49 }
 0x193   : > { %v1111_v61 = vunpack.c.l.bf16 %v1095_v18  ;;  %v1129_v34 = vmul.f32 0.00019607843, %v3398_v21  ;;  %v1193_v40 = vmul.f32 1.0001961, %v1177_v19  ;;  %v1458_v18 = vsel %vm1241_vm8, 1.0, %v1830_v57 }
 0x194   : > { %v1222_v37 = vsub.f32 0.0, %v1206_v20  ;;  %v1208_v31 = vsub.f32 %v1160_v35, %v1192_v60  ;;  %vm1242_vm9 = vcmp.ne.s32.totalorder %v1721_v55, 0 }
 0x195   : > { %v1143_v26 = vmul.f32 0.89980394, %v1111_v61 }
 0x196   : > { %v1286_v58 = vmul.f32 %v1455_v5, %v1222_v37  ;;  %v1224_v6 = vsub.f32 0.0, %v1208_v31 }
 0x197   : > { %v1159_v10 = vadd.f32 %v1143_v26, %v1127_v42 }
 0x198   : > { %v702_v23 = vpop.xlane.xlu0 %701  ;;  %v1306_v25 = vsel %vm1298_vm4, %v1286_v58, 0.0  ;;  %v1288_v3 = vmul.f32 %v1457_v59, %v1224_v6  ;;  %v1673_v47 = vpop.eup %1672 }
 0x199   : > { %v1207_v15 = vsub.f32 %v1159_v10, %v1191_v63  ;;  %v1307_v39 = vadd.f32 %v1306_v25, %v1305_v48  ;;  %v1049_v22 = vpop.xlane.xlu1 %1048  ;;  %1674 = vlog2.f32 %v702_v23  ;;  %v750_v1 = vmul.f32 0.6931472, %v1673_v47 }
 0x19a   : > { %v1059_v36 = vpop.xlane.xlu2 %1058  ;;  %v1097_v0 = vpack.c.bf16 %v1049_v22, %v1049_v22  ;;  %v1310_v24 = vsel %vm1298_vm4, %v1288_v3, 0.0  ;;  %1676 = vlog2.f32 %v3057_v4 }
 0x19b   : > { %v1223_v17 = vsub.f32 0.0, %v1207_v15  ;;  %v1178_v20 = vadd.f32 %v750_v1, %v2259_v14  ;;  %v1099_v5 = vpack.c.bf16 %v1059_v36, %v1059_v36  ;;  %v1459_v14 = vsel %vm1242_vm9, 1.0, %v1830_v57  ;;  %v1722_v36 = vld [vmem:[%s2229_s4 + $0x48] sm:$0xff] }
 0x19c   : > { %v1113_v46 = vunpack.c.l.bf16 %v1097_v0  ;;  %vm1243_vm10 = vcmp.ne.s32.totalorder %v1722_v36, 0 }
 0x19d   : > { %v1287_v51 = vmul.f32 %v1456_v44, %v1223_v17  ;;  %v1194_v31 = vmul.f32 1.0001961, %v1178_v20  ;;  %v1115_v63 = vunpack.c.l.bf16 %v1099_v5 }
 0x19e   : > { %v1145_v54 = vmul.f32 0.89980394, %v1113_v46 }
 0x19f   : > { %v1308_v53 = vsel %vm1298_vm4, %v1287_v51, 0.0  ;;  %v1675_v61 = vpop.eup %1674  ;;  %v1147_v15 = vmul.f32 0.89980394, %v1115_v63 }
 0x1a0   : > { %v1309_v62 = vadd.f32 %v1308_v53, %v1307_v39  ;;  %v1054_v32 = vpop.xlane.xlu0 %1053  ;;  %v1161_v41 = vadd.f32 %v1145_v54, %v1129_v34  ;;  %v752_v16 = vmul.f32 0.6931472, %v1675_v61  ;;  %v1677_v6 = vpop.eup %1676 }
 0x1a1   : > { %v712_v11 = vpop.xlane.xlu1 %711  ;;  %v1098_v33 = vpack.c.bf16 %v1054_v32, %v1054_v32  ;;  %v754_v22 = vmul.f32 0.6931472, %v1677_v6 }
 0x1a2   : > { %v1311_v8 = vadd.f32 %v1310_v24, %v1309_v62  ;;  %v1064_v9 = vpop.xlane.xlu2 %1063  ;;  %v1209_v2 = vsub.f32 %v1161_v41, %v1193_v40  ;;  %v1179_v23 = vadd.f32 %v752_v16, %v2277_v29  ;;  %1678 = vlog2.f32 %v712_v11 }
 0x1a3   : > { %v1114_v35 = vunpack.c.l.bf16 %v1098_v33  ;;  %v1100_v38 = vpack.c.bf16 %v1064_v9, %v1064_v9  ;;  %v1460_v29 = vsel %vm1243_vm10, 1.0, %v1830_v57  ;;  %v1180_v34 = vadd.f32 %v754_v22, %v2285_v27  ;;  %v1723_v9 = vld [vmem:[%s2229_s4 + $0x50] sm:$0xff] }
 0x1a4   : > { %v1225_v48 = vsub.f32 0.0, %v1209_v2  ;;  %v1195_v17 = vmul.f32 1.0001961, %v1179_v23  ;;  %vm1244_vm11 = vcmp.ne.s32.totalorder %v1723_v9, 0 }
 0x1a5   : > { %v1146_v37 = vmul.f32 0.89980394, %v1114_v35  ;;  %v1116_v50 = vunpack.c.l.bf16 %v1100_v38  ;;  %v1196_v33 = vmul.f32 1.0001961, %v1180_v34  ;;  %v1461_v20 = vsel %vm1244_vm11, 1.0, %v1830_v57 }
 0x1a6   : > { %v1289_v49 = vmul.f32 %v1458_v18, %v1225_v48 }
 0x1a7   : > { %v1148_v56 = vmul.f32 0.89980394, %v1116_v50 }
 0x1a8   : > { %v717_v52 = vpop.xlane.xlu0 %716  ;;  %v1312_v43 = vsel %vm1298_vm4, %v1289_v49, 0.0  ;;  %v1679_v21 = vpop.eup %1678 }
 0x1a9   : > { %v425_v60 = vpop.xlane.xlu1 %424  ;;  %v1313_v42 = vadd.f32 %v1312_v43, %v1311_v8  ;;  %v756_v11 = vmul.f32 0.6931472, %v1679_v21 }
 0x1aa   : > { %v1069_v45 = vpop.xlane.xlu2 %1068  ;;  %v1130_v26 = vmul.f32 0.00019607843, %v425_v60 }
 0x1ab   : > { %v1101_v54 = vpack.c.bf16 %v1069_v45, %v1069_v45  ;;  %v1181_v61 = vadd.f32 %v756_v11, %v2269_v7 }
 0x1ac   : > { %v1162_v59 = vadd.f32 %v1146_v37, %v1130_v26 }
 0x1ad   : > { %v1117_v1 = vunpack.c.l.bf16 %v1101_v54 }
 0x1ae   : > { %v1210_v58 = vsub.f32 %v1162_v59, %v1194_v31 }
 0x1b0   : > { %v722_v10 = vpop.xlane.xlu0 %721  ;;  %v1226_v25 = vsub.f32 0.0, %v1210_v58  ;;  %v1724_v58 = vld [vmem:[%s2229_s4 + $0x58] sm:$0xff] }
 0x1b1   : > { %v430_v4 = vpop.xlane.xlu1 %429  ;;  %1680 = vlog2.f32 %v722_v10  ;;  %vm1245_vm12 = vcmp.ne.s32.totalorder %v1724_v58, 0 }
 0x1b2   : > { %v1074_v44 = vpop.xlane.xlu2 %1073  ;;  %v1290_v39 = vmul.f32 %v1459_v14, %v1226_v25  ;;  %v1131_v3 = vmul.f32 0.00019607843, %v430_v4  ;;  %1682 = vlog2.f32 %v717_v52  ;;  %v1197_v14 = vmul.f32 1.0001961, %v1181_v61  ;;  %v1727_v61 = vld [vmem:[%s2229_s4 + $0x70] sm:$0xff] }
 0x1b3   : > { %v1102_v5 = vpack.c.bf16 %v1074_v44, %v1074_v44  ;;  %v1725_v44 = vld [vmem:[%s2229_s4 + $0x68] sm:$0xff]  ;;  %v1462_v38 = vsel %vm1245_vm12, 1.0, %v1830_v57  ;;  %vm1248_vm15 = vcmp.ne.s32.totalorder %v1727_v61, 0 }
 0x1b4   : > { %v1314_v0 = vsel %vm1298_vm4, %v1290_v39, 0.0  ;;  %v1163_v51 = vadd.f32 %v1147_v15, %v1131_v3  ;;  %vm1247_vm13 = vcmp.ne.s32.totalorder %v1725_v44, 0 }
 0x1b5   : > { %v1315_v46 = vadd.f32 %v1314_v0, %v1313_v42  ;;  %v1149_v42 = vmul.f32 0.89980394, %v1117_v1  ;;  %v1118_v10 = vunpack.c.l.bf16 %v1102_v5  ;;  %v1464_v21 = vsel %vm1247_vm13, 1.0, %v1830_v57 }
 0x1b6   : > { %v1211_v19 = vsub.f32 %v1163_v51, %v1195_v17  ;;  %v1726_v51 = vld [vmem:[%s2229_s4 + $0x60] sm:$0xff] }
 0x1b7   : > { %v1681_v47 = vpop.eup %1680  ;;  %v1150_v3 = vmul.f32 0.89980394, %v1118_v10  ;;  %vm1246_vm14 = vcmp.ne.s32.totalorder %v1726_v51, 0 }
 0x1b8   : > { %v727_v53 = vpop.xlane.xlu0 %726  ;;  %v1227_v62 = vsub.f32 0.0, %v1211_v19  ;;  %v760_v48 = vmul.f32 0.6931472, %v1681_v47  ;;  %v1683_v35 = vpop.eup %1682 }
 0x1b9   : > { %v435_v32 = vpop.xlane.xlu1 %434  ;;  %v758_v45 = vmul.f32 0.6931472, %v1683_v35  ;;  %1684 = vlog2.f32 %v727_v53 }
 0x1ba   : > { %v1079_v24 = vpop.xlane.xlu2 %1078  ;;  %v1291_v40 = vmul.f32 %v1460_v29, %v1227_v62  ;;  %v1132_v41 = vmul.f32 0.00019607843, %v435_v32  ;;  %v1183_v37 = vadd.f32 %v760_v48, %v3358_v13 }
 0x1bb   : > { %v1103_v8 = vpack.c.bf16 %v1079_v24, %v1079_v24  ;;  %v1182_v13 = vadd.f32 %v758_v45, %v2305_v12  ;;  %v1463_v24 = vsel %vm1246_vm14, 1.0, %v1830_v57 }
 0x1bc   : > { %v1316_v2 = vsel %vm1298_vm4, %v1291_v40, 0.0  ;;  %v1164_v18 = vadd.f32 %v1148_v56, %v1132_v41  ;;  %v1199_v15 = vmul.f32 1.0001961, %v1183_v37  ;;  %v1728_v37 = vld [vmem:[%s2229_s4 + $0x78] sm:$0xff] }
 0x1bd   : > { %v1317_v27 = vadd.f32 %v1316_v2, %v1315_v46  ;;  %v1119_v52 = vunpack.c.l.bf16 %v1103_v8  ;;  %v1198_v19 = vmul.f32 1.0001961, %v1182_v13  ;;  %vm1249_vm0 = vcmp.ne.s32.totalorder %v1728_v37, 0 }
 0x1be   : > { %v1212_v49 = vsub.f32 %v1164_v18, %v1196_v33 }
 0x1bf   : > { %v1151_v16 = vmul.f32 0.89980394, %v1119_v52  ;;  %v1685_v0 = vpop.eup %1684 }
 0x1c0   : > { %v732_v43 = vpop.xlane.xlu0 %731  ;;  %v1228_v60 = vsub.f32 0.0, %v1212_v49  ;;  %v762_v34 = vmul.f32 0.6931472, %v1685_v0 }
 0x1c1   : > { %v440_v26 = vpop.xlane.xlu1 %439  ;;  %1686 = vlog2.f32 %v732_v43 }
 0x1c2   : > { %v450_v55 = vpop.xlane.xlu2 %449  ;;  %v1292_v31 = vmul.f32 %v1461_v20, %v1228_v60  ;;  %v1133_v59 = vmul.f32 0.00019607843, %v440_v26  ;;  %v1184_v9 = vadd.f32 %v762_v34, %v3362_v28 }
 0x1c3   : > { %v1135_v63 = vmul.f32 0.00019607843, %v450_v55 }
 0x1c4   : > { %v1318_v7 = vsel %vm1298_vm4, %v1292_v31, 0.0  ;;  %v1165_v6 = vadd.f32 %v1149_v42, %v1133_v59  ;;  %v1200_v43 = vmul.f32 1.0001961, %v1184_v9  ;;  %v1465_v31 = vsel %vm1248_vm15, 1.0, %v1830_v57 }
 0x1c5   : > { %v1167_v23 = vadd.f32 %v1151_v16, %v1135_v63  ;;  %v1319_v25 = vadd.f32 %v1318_v7, %v1317_v27  ;;  %v1466_v63 = vsel %vm1249_vm0, 1.0, %v1830_v57 }
 0x1c6   : > { %v1213_v4 = vsub.f32 %v1165_v6, %v1197_v14 }
 0x1c7   : > { %v1215_v22 = vsub.f32 %v1167_v23, %v1199_v15  ;;  %v1687_v50 = vpop.eup %1686 }
 0x1c8   : > { %v445_v39 = vpop.xlane.xlu0 %444  ;;  %v1229_v36 = vsub.f32 0.0, %v1213_v4  ;;  %v764_v47 = vmul.f32 0.6931472, %v1687_v50 }
 0x1c9   : > { %v1134_v17 = vmul.f32 0.00019607843, %v445_v39  ;;  %v1084_v46 = vpop.xlane.xlu1 %1083  ;;  %v1231_v54 = vsub.f32 0.0, %v1215_v22 }
 0x1ca   : > { %v1293_v29 = vmul.f32 %v1462_v38, %v1229_v36  ;;  %v1104_v12 = vpack.c.bf16 %v1084_v46, %v1084_v46  ;;  %v460_v11 = vpop.xlane.xlu2 %459  ;;  %v1185_v1 = vadd.f32 %v764_v47, %v3352_v30 }
 0x1cb   : > { %v1166_v53 = vadd.f32 %v1150_v3, %v1134_v17  ;;  %v1295_v33 = vmul.f32 %v1464_v21, %v1231_v54  ;;  %v1137_v49 = vmul.f32 0.00019607843, %v460_v11 }
 0x1cc   : > { %v1320_v62 = vsel %vm1298_vm4, %v1293_v29, 0.0  ;;  %v1120_v56 = vunpack.c.l.bf16 %v1104_v12  ;;  %v1201_v26 = vmul.f32 1.0001961, %v1185_v1 }
 0x1cd   : > { %v1214_v32 = vsub.f32 %v1166_v53, %v1198_v19  ;;  %v1321_v40 = vadd.f32 %v1320_v62, %v1319_v25  ;;  %v1324_v28 = vsel %vm1298_vm4, %v1295_v33, 0.0 }
 0x1ce   : > { %v1152_v48 = vmul.f32 0.89980394, %v1120_v56 }
 0x1cf   : > { %v1230_v41 = vsub.f32 0.0, %v1214_v32 }
 0x1d0   : > { %v1089_v8 = vpop.xlane.xlu0 %1088 }
 0x1d1   : > { %v1294_v2 = vmul.f32 %v1463_v24, %v1230_v41  ;;  %v1105_v18 = vpack.c.bf16 %v1089_v8, %v1089_v8  ;;  %v455_v27 = vpop.xlane.xlu1 %454 }
 0x1d2   : > { %v1136_v52 = vmul.f32 0.00019607843, %v455_v27 }
 0x1d3   : > { %v1121_v35 = vunpack.c.l.bf16 %v1105_v18  ;;  %v1322_v20 = vsel %vm1298_vm4, %v1294_v2, 0.0 }
 0x1d4   : > { %v1323_v5 = vadd.f32 %v1322_v20, %v1321_v40  ;;  %v1168_v45 = vadd.f32 %v1152_v48, %v1136_v52 }
 0x1d5   : > { %v1153_v60 = vmul.f32 0.89980394, %v1121_v35 }
 0x1d6   : > { %v1325_v42 = vadd.f32 %v1324_v28, %v1323_v5  ;;  %v1216_v55 = vsub.f32 %v1168_v45, %v1200_v43 }
 0x1d7   : > { %v1169_v30 = vadd.f32 %v1153_v60, %v1137_v49 }
 0x1d8   : > { %v1232_v59 = vsub.f32 0.0, %v1216_v55 }
 0x1d9   : > { %v1217_v16 = vsub.f32 %v1169_v30, %v1201_v26 }
 0x1da   : > { %v1296_v14 = vmul.f32 %v1465_v31, %v1232_v59 }
 0x1db   : > { %v1233_v58 = vsub.f32 0.0, %v1217_v16 }
 0x1dc   : > { %v1326_v7 = vsel %vm1298_vm4, %v1296_v14, 0.0 }
 0x1dd   : > { %v1297_v10 = vmul.f32 %v1466_v63, %v1233_v58  ;;  %v1327_v6 = vadd.f32 %v1326_v7, %v1325_v42 }
 0x1df   : > { %v1328_v23 = vsel %vm1298_vm4, %v1297_v10, 0.0 }
 0x1e0   : > { %v1329_v25 = vadd.f32 %v1328_v23, %v1327_v6 }
 0x1e2   : > { %1330 = vadd.xlane.f32.xlu0 %v1329_v25 }
 0x255   : > { %v1331_v13 = vpop.xlane.xlu0 %1330 }
 0x256   : > { %v1332_v15 = vrot.slane %v1331_v13, 4 }
 0x258   : > { %v1333_v4 = vadd.f32 %v1332_v15, %v1331_v13 }
 0x25a   : > { %v1334_v44 = vrot.slane %v1333_v4, 2 }
 0x25c   : > { %v1335_v38 = vadd.f32 %v1334_v44, %v1333_v4 }
 0x25e   : > { %v1336_v39 = vrot.slane %v1335_v38, 1 }
 0x260   : > { %v1337_v57 = vadd.f32 %v1336_v39, %v1335_v38 }
 0x262   : > { %1473 = vpush %v1337_v57 }
 0x293   : > { %s1474_s23 = spop %1473 }
 0x294   : > { %v1339_v3 = vstv %s1474_s23 }
 0x295   : > { %1340 = vst [vmem:[%s180_s16] sm:$0xff] %v1339_v3 }
 0x296   : > { %1786 = shalt.err (!%p1783_p5)
}
 0x297   : > { %1477 = dma.vmem_to_hbm [thread:$0]  (%p1895_p10), %s1355_s17, 128, %s1357_s19, %s1342_s24  }
 0x298 PF: > { %p1488_p7 = scmp.ge.s32.totalorder %s1825_s12, 2  ;;  %s1368_s25 = sand.u32 1, %s1813_s9  }
 0x299   : > { %s1369_s3 = scalar_lea.sflag [#allocation4], %s1368_s25 }
 0x29a   : > { %p1484_p8 = pnand %p1488_p7, %p1899_p11 }
 0x29c   : > { %p1485_p9 = pneg %p1484_p8 }
 0x29e   : > { %1808 = dma.done.wait (%p1485_p9), %s1369_s3, 128  }
 0x29f   : > { %1810 = vsyncadd (%p1485_p9), %s1369_s3, 4294967168  ;;  %p15_p1 = scmp.ge.s32.totalorder %s1871_s15, 6   ;;  %s3399_s9 = smov %s1817_s10 }
 0x2a0   : > { %s3400_s10 = smov %s1821_s11  ;;  %s3401_s11 = smov %s1883_s18 }
 0x2a1   : > { %s3402_s12 = smov %s1871_s15  ;;  %17 = sbr.rel (!%p15_p1) target bundleno = 5 (0x5), region = 76 }
 0x2a6   :  { %1375 = vsyncpa [#allocation3], 1 }
 0x2a7   :  { %1377 = vsyncpa [#allocation3 + $0x1], 1 }
 0x2a8   :  { %1378 = vsyncpa [#allocation4], 1 }
 0x2a9   :  { %1380 = vsyncpa [#allocation4 + $0x1], 1 }

</bundles_post_ra>
